<compile_context>
chip_gen: v5e
topology: v5e:2x2
jax: 0.10.0
libtpu: 0.0.40
codegen_flags: <defaults>
</compile_context>

<pallas_src>
import functools

import jax
import jax.numpy as jnp
from jax import lax
from jax.experimental import pallas as pl
from jax.experimental.pallas import tpu as pltpu

# ---- mini-BERT config (small, deterministic, synthetic) ----
VOCAB = 64
HIDDEN = 32
LAYERS = 2
HEADS = 2
HEAD_DIM = HIDDEN // HEADS
FFN = 64
MAX_POS = 16
NUM_LABELS = 3
EPS = 1e-12
NEG_INF = -1e9


# ----------------- small in-kernel helpers -----------------

def _gelu(x):
    # TODO(synk): HF BERT uses erf-GELU; tanh approximation used here (Mosaic-friendly, ~1e-3 close).
    c = 0.7978845608028654
    return 0.5 * x * (1.0 + jnp.tanh(c * (x + 0.044715 * x * x * x)))


def _layernorm(x, g, b):
    mu = jnp.mean(x, axis=-1, keepdims=True)
    var = jnp.mean((x - mu) ** 2, axis=-1, keepdims=True)
    return (x - mu) * lax.rsqrt(var + EPS) * g + b


def _bf16(x):
    return x.astype(jnp.bfloat16)


# ----------------- the single fused Pallas kernel -----------------

def _bert_fused_kernel(
    x_ref, mask_ref, eg_ref, eb_ref,
    wqkv_ref, bqkv_ref, wo_ref, bo_ref, ln1g_ref, ln1b_ref,
    w1_ref, b1_ref, w2_ref, b2_ref, ln2g_ref, ln2b_ref,
    cw_ref, cb_ref,
    out_ref,
    qkv_ref, ctx_ref,
    *, batch, seq,
):
    """Whole mini-BERT forward for (batch*seq, HIDDEN) token slab -> (batch, NUM_LABELS)."""
    scale = 1.0 / (HEAD_DIM ** 0.5)

    # --- embedding LayerNorm (no dead residual add) ---
    x = _layernorm(x_ref[...], eg_ref[...], eb_ref[...])           # (B*S, H) f32

    for l in range(LAYERS):
        # ---- fused Q|K|V projection: one MXU pass, bf16 operands, f32 accumulate ----
        qkv_ref[...] = (
            jnp.dot(_bf16(x), wqkv_ref[l], preferred_element_type=jnp.float32)
            + bqkv_ref[l]
        )                                                           # (B*S, 3H)

        # ---- attention, per (batch, head), fully unrolled (B*HEADS = 4 tiny tiles) ----
        for b in range(batch):
            bias_b = (1.0 - mask_ref[b:b + 1, :]) * NEG_INF         # (1, S) built in-kernel
            r0, r1 = b * seq, (b + 1) * seq
            for h in range(HEADS):
                c0 = h * HEAD_DIM
                q_bh = _bf16(qkv_ref[r0:r1, c0:c0 + HEAD_DIM])                      # (S, Dh)
                k_bh = _bf16(qkv_ref[r0:r1, HIDDEN + c0:HIDDEN + c0 + HEAD_DIM])    # (S, Dh)
                v_bh = _bf16(qkv_ref[r0:r1, 2 * HIDDEN + c0:2 * HIDDEN + c0 + HEAD_DIM])
                # q @ k^T without an explicit transpose (contract last dims)
                s = lax.dot_general(q_bh, k_bh, (((1,), (1,)), ((), ())),
                                    preferred_element_type=jnp.float32)
                s = s * scale + bias_b
                s = s - jnp.max(s, axis=-1, keepdims=True)
                p = jnp.exp(s)
                p = p * pl.reciprocal(jnp.sum(p, axis=-1, keepdims=True), approx=True)
                ctx_ref[r0:r1, c0:c0 + HEAD_DIM] = jnp.dot(
                    _bf16(p), v_bh, preferred_element_type=jnp.float32)

        # ---- attention output projection + residual + LayerNorm ----
        attn_out = (
            jnp.dot(_bf16(ctx_ref[...]), wo_ref[l], preferred_element_type=jnp.float32)
            + bo_ref[l]
        )
        x = _layernorm(attn_out + x, ln1g_ref[l], ln1b_ref[l])

        # ---- feed-forward + residual + LayerNorm ----
        h1 = _gelu(
            jnp.dot(_bf16(x), w1_ref[l], preferred_element_type=jnp.float32) + b1_ref[l])
        h2 = jnp.dot(_bf16(h1), w2_ref[l], preferred_element_type=jnp.float32) + b2_ref[l]
        x = _layernorm(h2 + x, ln2g_ref[l], ln2b_ref[l])

    # ---- classifier on concat([CLS, last]) without materializing the concat ----
    # logits_b = cls_row @ W[:H] + last_row @ W[H:] + b
    ctx_ref[...] = x                          # stage final hidden states for row slicing
    cw = cw_ref[...]                          # (2H, NUM_LABELS)
    cb = cb_ref[...]                          # (1, NUM_LABELS)
    for b in range(batch):
        cls_row = ctx_ref[b * seq:b * seq + 1, :]                    # (1, H)
        last_row = ctx_ref[(b + 1) * seq - 1:(b + 1) * seq, :]       # (1, H)
        out_ref[b:b + 1, :] = (
            jnp.dot(cls_row, cw[:HIDDEN, :], preferred_element_type=jnp.float32)
            + jnp.dot(last_row, cw[HIDDEN:, :], preferred_element_type=jnp.float32)
            + cb)


# ----------------- parameter init (deterministic, synthetic) -----------------

def init_params(key):
    def normal(key, shape):
        return (0.02 * jax.random.normal(key, shape)).astype(jnp.float32)

    keys = iter(jax.random.split(key, 256))
    p = {
        "word_emb": normal(next(keys), (VOCAB, HIDDEN)),
        "pos_emb": normal(next(keys), (MAX_POS, HIDDEN)),
        "type_emb": normal(next(keys), (2, HIDDEN)),
        "emb_ln_g": jnp.ones((HIDDEN,), jnp.float32),
        "emb_ln_b": jnp.zeros((HIDDEN,), jnp.float32),
        "layers": [],
        # classifier takes concat of CLS + last token -> hidden_size * 2
        "cls_w": normal(next(keys), (2 * HIDDEN, NUM_LABELS)),
        "cls_b": jnp.zeros((NUM_LABELS,), jnp.float32),
    }
    for _ in range(LAYERS):
        lp = {
            "wq": normal(next(keys), (HIDDEN, HIDDEN)), "bq": jnp.zeros((HIDDEN,), jnp.float32),
            "wk": normal(next(keys), (HIDDEN, HIDDEN)), "bk": jnp.zeros((HIDDEN,), jnp.float32),
            "wv": normal(next(keys), (HIDDEN, HIDDEN)), "bv": jnp.zeros((HIDDEN,), jnp.float32),
            "wo": normal(next(keys), (HIDDEN, HIDDEN)), "bo": jnp.zeros((HIDDEN,), jnp.float32),
            "ln1_g": jnp.ones((HIDDEN,), jnp.float32), "ln1_b": jnp.zeros((HIDDEN,), jnp.float32),
            "w1": normal(next(keys), (HIDDEN, FFN)), "b1": jnp.zeros((FFN,), jnp.float32),
            "w2": normal(next(keys), (FFN, HIDDEN)), "b2": jnp.zeros((HIDDEN,), jnp.float32),
            "ln2_g": jnp.ones((HIDDEN,), jnp.float32), "ln2_b": jnp.zeros((HIDDEN,), jnp.float32),
        }
        p["layers"].append(lp)
    return p


def pack_params(p):
    """Pack per-layer weights onto a leading LAYERS axis, fuse Q|K|V, cast matmul weights to bf16."""
    bf = jnp.bfloat16
    L = p["layers"]
    return {
        "word_emb": p["word_emb"],
        "pos_emb": p["pos_emb"],
        "type_emb": p["type_emb"],
        "emb_ln_g": p["emb_ln_g"].reshape(1, HIDDEN),
        "emb_ln_b": p["emb_ln_b"].reshape(1, HIDDEN),
        "wqkv": jnp.stack([jnp.concatenate([lp["wq"], lp["wk"], lp["wv"]], axis=1)
                           for lp in L]).astype(bf),                         # (L, H, 3H)
        "bqkv": jnp.stack([jnp.concatenate([lp["bq"], lp["bk"], lp["bv"]]).reshape(1, 3 * HIDDEN)
                           for lp in L]),                                    # (L, 1, 3H)
        "wo": jnp.stack([lp["wo"] for lp in L]).astype(bf),
        "bo": jnp.stack([lp["bo"].reshape(1, HIDDEN) for lp in L]),
        "ln1_g": jnp.stack([lp["ln1_g"].reshape(1, HIDDEN) for lp in L]),
        "ln1_b": jnp.stack([lp["ln1_b"].reshape(1, HIDDEN) for lp in L]),
        "w1": jnp.stack([lp["w1"] for lp in L]).astype(bf),
        "b1": jnp.stack([lp["b1"].reshape(1, FFN) for lp in L]),
        "w2": jnp.stack([lp["w2"] for lp in L]).astype(bf),
        "b2": jnp.stack([lp["b2"].reshape(1, HIDDEN) for lp in L]),
        "ln2_g": jnp.stack([lp["ln2_g"].reshape(1, HIDDEN) for lp in L]),
        "ln2_b": jnp.stack([lp["ln2_b"].reshape(1, HIDDEN) for lp in L]),
        "cls_w": p["cls_w"],                       # (2H, NUM_LABELS) f32
        "cls_b": p["cls_b"].reshape(1, NUM_LABELS),
    }


# ----------------- forward pass (one fused pallas_call) -----------------

def bert_classify(packed, input_ids, attention_mask):
    B, S = input_ids.shape

    # TODO(synk): embedding-table gather (data-dependent row lookup) stays in plain JAX.
    emb = (packed["word_emb"][input_ids]
           + packed["pos_emb"][:S][None, :, :]
           + packed["type_emb"][0][None, None, :])          # token_type_ids == 0
    x = emb.reshape(B * S, HIDDEN).astype(jnp.float32)
    mask_f = attention_mask.astype(jnp.float32)             # (B, S); bias built in-kernel

    kernel = functools.partial(_bert_fused_kernel, batch=B, seq=S)
    return pl.pallas_call(
        kernel,
        out_shape=jax.ShapeDtypeStruct((B, NUM_LABELS), jnp.float32),
        scratch_shapes=[
            pltpu.VMEM((B * S, 3 * HIDDEN), jnp.float32),    # fused QKV slab
            pltpu.VMEM((B * S, HIDDEN), jnp.float32),        # attention ctx / final-hidden staging
        ],
    )(x, mask_f,
      packed["emb_ln_g"], packed["emb_ln_b"],
      packed["wqkv"], packed["bqkv"], packed["wo"], packed["bo"],
      packed["ln1_g"], packed["ln1_b"],
      packed["w1"], packed["b1"], packed["w2"], packed["b2"],
      packed["ln2_g"], packed["ln2_b"],
      packed["cls_w"], packed["cls_b"])


# ----------------- pure-JAX f32 reference (correctness check) -----------------

def bert_reference(params, input_ids, attention_mask):
    B, S = input_ids.shape
    emb = (params["word_emb"][input_ids]
           + params["pos_emb"][:S][None, :, :]
           + params["type_emb"][0][None, None, :])
    x = emb.reshape(B * S, HIDDEN).astype(jnp.float32)
    x = _layernorm(x, params["emb_ln_g"], params["emb_ln_b"])
    bias = ((1.0 - attention_mask.astype(jnp.float32)) * NEG_INF)[:, None, None, :]
    scale = 1.0 / (HEAD_DIM ** 0.5)

    def heads(t):
        return t.reshape(B, S, HEADS, HEAD_DIM).transpose(0, 2, 1, 3)

    for lp in params["layers"]:
        q = x @ lp["wq"] + lp["bq"]
        k = x @ lp["wk"] + lp["bk"]
        v = x @ lp["wv"] + lp["bv"]
        qh, kh, vh = heads(q), heads(k), heads(v)
        s = jnp.einsum("bhqd,bhkd->bhqk", qh, kh) * scale + bias
        s = s - jnp.max(s, axis=-1, keepdims=True)
        p = jnp.exp(s)
        p = p / jnp.sum(p, axis=-1, keepdims=True)
        ctx = jnp.einsum("bhqk,bhkd->bhqd", p, vh)
        ctx = ctx.transpose(0, 2, 1, 3).reshape(B * S, HIDDEN)
        x = _layernorm(ctx @ lp["wo"] + lp["bo"] + x, lp["ln1_g"], lp["ln1_b"])
        h = _gelu(x @ lp["w1"] + lp["b1"])
        h = h @ lp["w2"] + lp["b2"]
        x = _layernorm(h + x, lp["ln2_g"], lp["ln2_b"])

    hidden = x.reshape(B, S, HIDDEN)
    pooled = jnp.concatenate([hidden[:, 0, :], hidden[:, -1, :]], axis=1)
    return pooled @ params["cls_w"] + params["cls_b"]


if __name__ == "__main__":
    key = jax.random.PRNGKey(0)
    k_param, k_ids = jax.random.split(key)

    params = init_params(k_param)
    packed = pack_params(params)

    B, S = 2, 8
    input_ids = jax.random.randint(k_ids, (B, S), 0, VOCAB, dtype=jnp.int32)
    # second sequence has two padding positions at the end
    attention_mask = jnp.array([[1, 1, 1, 1, 1, 1, 1, 1],
                                [1, 1, 1, 1, 1, 1, 0, 0]], dtype=jnp.int32)

    fwd = jax.jit(bert_classify)
    logits = fwd(packed, input_ids, attention_mask)
    jax.block_until_ready(logits)

    assert logits.shape == (B, NUM_LABELS)
    assert logits.dtype == jnp.float32
    assert bool(jnp.all(jnp.isfinite(logits)))

    # loose tolerance: kernel uses bf16 MXU operands + approx reciprocal; reference is exact f32
    ref = bert_reference(params, input_ids, attention_mask)
    err = float(jnp.max(jnp.abs(logits - ref)))
    assert err < 5e-2, f"kernel/reference mismatch: max|diff|={err}"

    print("KERNEL_OK")
</pallas_src>

<mosaic_0001>
module attributes {stable_mosaic.version = 11 : i64} {
  func.func @_bert_fused_kernel(%arg0: memref<16x32xf32, #tpu.memory_space<vmem>>, %arg1: memref<2x8xf32, #tpu.memory_space<vmem>>, %arg2: memref<1x32xf32, #tpu.memory_space<vmem>>, %arg3: memref<1x32xf32, #tpu.memory_space<vmem>>, %arg4: memref<2x32x96xbf16, #tpu.memory_space<vmem>>, %arg5: memref<2x1x96xf32, #tpu.memory_space<vmem>>, %arg6: memref<2x32x32xbf16, #tpu.memory_space<vmem>>, %arg7: memref<2x1x32xf32, #tpu.memory_space<vmem>>, %arg8: memref<2x1x32xf32, #tpu.memory_space<vmem>>, %arg9: memref<2x1x32xf32, #tpu.memory_space<vmem>>, %arg10: memref<2x32x64xbf16, #tpu.memory_space<vmem>>, %arg11: memref<2x1x64xf32, #tpu.memory_space<vmem>>, %arg12: memref<2x64x32xbf16, #tpu.memory_space<vmem>>, %arg13: memref<2x1x32xf32, #tpu.memory_space<vmem>>, %arg14: memref<2x1x32xf32, #tpu.memory_space<vmem>>, %arg15: memref<2x1x32xf32, #tpu.memory_space<vmem>>, %arg16: memref<64x3xf32, #tpu.memory_space<vmem>>, %arg17: memref<1x3xf32, #tpu.memory_space<vmem>>, %arg18: memref<2x3xf32, #tpu.memory_space<vmem>>, %arg19: memref<16x96xf32, #tpu.memory_space<vmem>>, %arg20: memref<16x32xf32, #tpu.memory_space<vmem>>) attributes {dimension_semantics = [], scalar_prefetch = 0 : i64, scratch_operands = 2 : i64, tpu.core_type = #tpu.core_type<tc>} {
    %c0 = arith.constant 0 : index
    %c0_0 = arith.constant 0 : index
    %0 = vector.load %arg0[%c0, %c0_0] : memref<16x32xf32, #tpu.memory_space<vmem>>, vector<16x32xf32>
    %c0_1 = arith.constant 0 : index
    %c0_2 = arith.constant 0 : index
    %1 = vector.load %arg2[%c0_1, %c0_2] : memref<1x32xf32, #tpu.memory_space<vmem>>, vector<1x32xf32>
    %c0_3 = arith.constant 0 : index
    %c0_4 = arith.constant 0 : index
    %2 = vector.load %arg3[%c0_3, %c0_4] : memref<1x32xf32, #tpu.memory_space<vmem>>, vector<1x32xf32>
    %cst = arith.constant dense<0.000000e+00> : vector<16xf32>
    %3 = vector.multi_reduction <add>, %0, %cst [1] : vector<16x32xf32> to vector<16xf32>
    %4 = vector.shape_cast %3 : vector<16xf32> to vector<16x1xf32>
    %cst_5 = arith.constant 3.200000e+01 : f32
    %5 = vector.broadcast %cst_5 : f32 to vector<16x1xf32>
    %6 = arith.divf %4, %5 : vector<16x1xf32>
    %7 = vector.broadcast %6 : vector<16x1xf32> to vector<16x32xf32>
    %8 = arith.subf %0, %7 : vector<16x32xf32>
    %9 = arith.mulf %8, %8 : vector<16x32xf32>
    %cst_6 = arith.constant dense<0.000000e+00> : vector<16xf32>
    %10 = vector.multi_reduction <add>, %9, %cst_6 [1] : vector<16x32xf32> to vector<16xf32>
    %11 = vector.shape_cast %10 : vector<16xf32> to vector<16x1xf32>
    %cst_7 = arith.constant 3.200000e+01 : f32
    %12 = vector.broadcast %cst_7 : f32 to vector<16x1xf32>
    %13 = arith.divf %11, %12 : vector<16x1xf32>
    %14 = vector.broadcast %6 : vector<16x1xf32> to vector<16x32xf32>
    %15 = arith.subf %0, %14 : vector<16x32xf32>
    %cst_8 = arith.constant 9.99999996E-13 : f32
    %16 = vector.broadcast %cst_8 : f32 to vector<16x1xf32>
    %17 = arith.addf %13, %16 : vector<16x1xf32>
    %18 = math.rsqrt %17 : vector<16x1xf32>
    %19 = vector.broadcast %18 : vector<16x1xf32> to vector<16x32xf32>
    %20 = arith.mulf %15, %19 : vector<16x32xf32>
    %21 = vector.broadcast %1 : vector<1x32xf32> to vector<16x32xf32>
    %22 = arith.mulf %20, %21 : vector<16x32xf32>
    %23 = vector.broadcast %2 : vector<1x32xf32> to vector<16x32xf32>
    %24 = arith.addf %22, %23 : vector<16x32xf32>
    %25 = arith.truncf %24 : vector<16x32xf32> to vector<16x32xbf16>
    %c0_9 = arith.constant 0 : index
    %c0_10 = arith.constant 0 : index
    %c0_11 = arith.constant 0 : index
    %26 = vector.load %arg4[%c0_9, %c0_10, %c0_11] : memref<2x32x96xbf16, #tpu.memory_space<vmem>>, vector<1x32x96xbf16>
    %27 = vector.shape_cast %26 : vector<1x32x96xbf16> to vector<32x96xbf16>
    %cst_12 = arith.constant dense<0.000000e+00> : vector<16x96xf32>
    %28 = tpu.matmul %25, %27, %cst_12 {dimension_numbers = #tpu.dot_dimension_numbers<[1], [0], [0], [1], [0, 0, 1, 1], [], []>} : vector<16x32xbf16>, vector<32x96xbf16>, vector<16x96xf32> -> vector<16x96xf32>
    %c0_13 = arith.constant 0 : index
    %c0_14 = arith.constant 0 : index
    %c0_15 = arith.constant 0 : index
    %29 = vector.load %arg5[%c0_13, %c0_14, %c0_15] : memref<2x1x96xf32, #tpu.memory_space<vmem>>, vector<1x1x96xf32>
    %30 = vector.shape_cast %29 : vector<1x1x96xf32> to vector<1x96xf32>
    %31 = vector.broadcast %30 : vector<1x96xf32> to vector<16x96xf32>
    %32 = arith.addf %28, %31 : vector<16x96xf32>
    %c0_16 = arith.constant 0 : index
    %c0_17 = arith.constant 0 : index
    %33 = vector.load %arg19[%c0_16, %c0_17] : memref<16x96xf32, #tpu.memory_space<vmem>>, vector<16x96xf32>
    tpu.vector_store %arg19[%c0_16, %c0_17], %32 {strides = array<i32>} : memref<16x96xf32, #tpu.memory_space<vmem>>, vector<16x96xf32>,
    %c0_18 = arith.constant 0 : index
    %c0_19 = arith.constant 0 : index
    %34 = vector.load %arg1[%c0_18, %c0_19] : memref<2x8xf32, #tpu.memory_space<vmem>>, vector<1x8xf32>
    %cst_20 = arith.constant 1.000000e+00 : f32
    %35 = vector.broadcast %cst_20 : f32 to vector<1x8xf32>
    %36 = arith.subf %35, %34 : vector<1x8xf32>
    %cst_21 = arith.constant -1.000000e+09 : f32
    %37 = vector.broadcast %cst_21 : f32 to vector<1x8xf32>
    %38 = arith.mulf %36, %37 : vector<1x8xf32>
    %c0_22 = arith.constant 0 : index
    %c0_23 = arith.constant 0 : index
    %39 = vector.load %arg19[%c0_22, %c0_23] : memref<16x96xf32, #tpu.memory_space<vmem>>, vector<8x16xf32>
    %40 = arith.truncf %39 : vector<8x16xf32> to vector<8x16xbf16>
    %c0_24 = arith.constant 0 : index
    %c32 = arith.constant 32 : index
    %41 = vector.load %arg19[%c0_24, %c32] : memref<16x96xf32, #tpu.memory_space<vmem>>, vector<8x16xf32>
    %42 = arith.truncf %41 : vector<8x16xf32> to vector<8x16xbf16>
    %c0_25 = arith.constant 0 : index
    %c64 = arith.constant 64 : index
    %43 = vector.load %arg19[%c0_25, %c64] : memref<16x96xf32, #tpu.memory_space<vmem>>, vector<8x16xf32>
    %44 = arith.truncf %43 : vector<8x16xf32> to vector<8x16xbf16>
    %cst_26 = arith.constant dense<0.000000e+00> : vector<8x8xf32>
    %45 = tpu.matmul %40, %42, %cst_26 {dimension_numbers = #tpu.dot_dimension_numbers<[1], [1], [0], [0], [0, 0, 1, 0], [], []>} : vector<8x16xbf16>, vector<8x16xbf16>, vector<8x8xf32> -> vector<8x8xf32>
    %cst_27 = arith.constant 2.500000e-01 : f32
    %46 = vector.broadcast %cst_27 : f32 to vector<8x8xf32>
    %47 = arith.mulf %45, %46 : vector<8x8xf32>
    %48 = vector.broadcast %38 : vector<1x8xf32> to vector<8x8xf32>
    %49 = arith.addf %47, %48 : vector<8x8xf32>
    %cst_28 = arith.constant dense<0xFF800000> : vector<8xf32>
    %50 = vector.multi_reduction <maximumf>, %49, %cst_28 [1] : vector<8x8xf32> to vector<8xf32>
    %51 = vector.shape_cast %50 : vector<8xf32> to vector<8x1xf32>
    %52 = vector.broadcast %51 : vector<8x1xf32> to vector<8x8xf32>
    %53 = arith.subf %49, %52 : vector<8x8xf32>
    %54 = math.exp %53 : vector<8x8xf32>
    %cst_29 = arith.constant dense<0.000000e+00> : vector<8xf32>
    %55 = vector.multi_reduction <add>, %54, %cst_29 [1] : vector<8x8xf32> to vector<8xf32>
    %56 = vector.shape_cast %55 : vector<8xf32> to vector<8x1xf32>
    %57 = tpu.reciprocal %56 {approx = true} : vector<8x1xf32> -> vector<8x1xf32>
    %58 = vector.broadcast %57 : vector<8x1xf32> to vector<8x8xf32>
    %59 = arith.mulf %54, %58 : vector<8x8xf32>
    %60 = arith.truncf %59 : vector<8x8xf32> to vector<8x8xbf16>
    %cst_30 = arith.constant dense<0.000000e+00> : vector<8x16xf32>
    %61 = tpu.matmul %60, %44, %cst_30 {dimension_numbers = #tpu.dot_dimension_numbers<[1], [0], [0], [1], [0, 0, 1, 1], [], []>} : vector<8x8xbf16>, vector<8x16xbf16>, vector<8x16xf32> -> vector<8x16xf32>
    %c0_31 = arith.constant 0 : index
    %c0_32 = arith.constant 0 : index
    %62 = vector.load %arg20[%c0_31, %c0_32] : memref<16x32xf32, #tpu.memory_space<vmem>>, vector<8x16xf32>
    tpu.vector_store %arg20[%c0_31, %c0_32], %61 {strides = array<i32>} : memref<16x32xf32, #tpu.memory_space<vmem>>, vector<8x16xf32>,
    %c0_33 = arith.constant 0 : index
    %c16 = arith.constant 16 : index
    %63 = vector.load %arg19[%c0_33, %c16] : memref<16x96xf32, #tpu.memory_space<vmem>>, vector<8x16xf32>
    %64 = arith.truncf %63 : vector<8x16xf32> to vector<8x16xbf16>
    %c0_34 = arith.constant 0 : index
    %c48 = arith.constant 48 : index
    %65 = vector.load %arg19[%c0_34, %c48] : memref<16x96xf32, #tpu.memory_space<vmem>>, vector<8x16xf32>
    %66 = arith.truncf %65 : vector<8x16xf32> to vector<8x16xbf16>
    %c0_35 = arith.constant 0 : index
    %c80 = arith.constant 80 : index
    %67 = vector.load %arg19[%c0_35, %c80] : memref<16x96xf32, #tpu.memory_space<vmem>>, vector<8x16xf32>
    %68 = arith.truncf %67 : vector<8x16xf32> to vector<8x16xbf16>
    %cst_36 = arith.constant dense<0.000000e+00> : vector<8x8xf32>
    %69 = tpu.matmul %64, %66, %cst_36 {dimension_numbers = #tpu.dot_dimension_numbers<[1], [1], [0], [0], [0, 0, 1, 0], [], []>} : vector<8x16xbf16>, vector<8x16xbf16>, vector<8x8xf32> -> vector<8x8xf32>
    %cst_37 = arith.constant 2.500000e-01 : f32
    %70 = vector.broadcast %cst_37 : f32 to vector<8x8xf32>
    %71 = arith.mulf %69, %70 : vector<8x8xf32>
    %72 = vector.broadcast %38 : vector<1x8xf32> to vector<8x8xf32>
    %73 = arith.addf %71, %72 : vector<8x8xf32>
    %cst_38 = arith.constant dense<0xFF800000> : vector<8xf32>
    %74 = vector.multi_reduction <maximumf>, %73, %cst_38 [1] : vector<8x8xf32> to vector<8xf32>
    %75 = vector.shape_cast %74 : vector<8xf32> to vector<8x1xf32>
    %76 = vector.broadcast %75 : vector<8x1xf32> to vector<8x8xf32>
    %77 = arith.subf %73, %76 : vector<8x8xf32>
    %78 = math.exp %77 : vector<8x8xf32>
    %cst_39 = arith.constant dense<0.000000e+00> : vector<8xf32>
    %79 = vector.multi_reduction <add>, %78, %cst_39 [1] : vector<8x8xf32> to vector<8xf32>
    %80 = vector.shape_cast %79 : vector<8xf32> to vector<8x1xf32>
    %81 = tpu.reciprocal %80 {approx = true} : vector<8x1xf32> -> vector<8x1xf32>
    %82 = vector.broadcast %81 : vector<8x1xf32> to vector<8x8xf32>
    %83 = arith.mulf %78, %82 : vector<8x8xf32>
    %84 = arith.truncf %83 : vector<8x8xf32> to vector<8x8xbf16>
    %cst_40 = arith.constant dense<0.000000e+00> : vector<8x16xf32>
    %85 = tpu.matmul %84, %68, %cst_40 {dimension_numbers = #tpu.dot_dimension_numbers<[1], [0], [0], [1], [0, 0, 1, 1], [], []>} : vector<8x8xbf16>, vector<8x16xbf16>, vector<8x16xf32> -> vector<8x16xf32>
    %c0_41 = arith.constant 0 : index
    %c16_42 = arith.constant 16 : index
    %86 = vector.load %arg20[%c0_41, %c16_42] : memref<16x32xf32, #tpu.memory_space<vmem>>, vector<8x16xf32>
    tpu.vector_store %arg20[%c0_41, %c16_42], %85 {strides = array<i32>} : memref<16x32xf32, #tpu.memory_space<vmem>>, vector<8x16xf32>,
    %c1 = arith.constant 1 : index
    %c0_43 = arith.constant 0 : index
    %87 = vector.load %arg1[%c1, %c0_43] : memref<2x8xf32, #tpu.memory_space<vmem>>, vector<1x8xf32>
    %cst_44 = arith.constant 1.000000e+00 : f32
    %88 = vector.broadcast %cst_44 : f32 to vector<1x8xf32>
    %89 = arith.subf %88, %87 : vector<1x8xf32>
    %cst_45 = arith.constant -1.000000e+09 : f32
    %90 = vector.broadcast %cst_45 : f32 to vector<1x8xf32>
    %91 = arith.mulf %89, %90 : vector<1x8xf32>
    %c8 = arith.constant 8 : index
    %c0_46 = arith.constant 0 : index
    %92 = vector.load %arg19[%c8, %c0_46] : memref<16x96xf32, #tpu.memory_space<vmem>>, vector<8x16xf32>
    %93 = arith.truncf %92 : vector<8x16xf32> to vector<8x16xbf16>
    %c8_47 = arith.constant 8 : index
    %c32_48 = arith.constant 32 : index
    %94 = vector.load %arg19[%c8_47, %c32_48] : memref<16x96xf32, #tpu.memory_space<vmem>>, vector<8x16xf32>
    %95 = arith.truncf %94 : vector<8x16xf32> to vector<8x16xbf16>
    %c8_49 = arith.constant 8 : index
    %c64_50 = arith.constant 64 : index
    %96 = vector.load %arg19[%c8_49, %c64_50] : memref<16x96xf32, #tpu.memory_space<vmem>>, vector<8x16xf32>
    %97 = arith.truncf %96 : vector<8x16xf32> to vector<8x16xbf16>
    %cst_51 = arith.constant dense<0.000000e+00> : vector<8x8xf32>
    %98 = tpu.matmul %93, %95, %cst_51 {dimension_numbers = #tpu.dot_dimension_numbers<[1], [1], [0], [0], [0, 0, 1, 0], [], []>} : vector<8x16xbf16>, vector<8x16xbf16>, vector<8x8xf32> -> vector<8x8xf32>
    %cst_52 = arith.constant 2.500000e-01 : f32
    %99 = vector.broadcast %cst_52 : f32 to vector<8x8xf32>
    %100 = arith.mulf %98, %99 : vector<8x8xf32>
    %101 = vector.broadcast %91 : vector<1x8xf32> to vector<8x8xf32>
    %102 = arith.addf %100, %101 : vector<8x8xf32>
    %cst_53 = arith.constant dense<0xFF800000> : vector<8xf32>
    %103 = vector.multi_reduction <maximumf>, %102, %cst_53 [1] : vector<8x8xf32> to vector<8xf32>
    %104 = vector.shape_cast %103 : vector<8xf32> to vector<8x1xf32>
    %105 = vector.broadcast %104 : vector<8x1xf32> to vector<8x8xf32>
    %106 = arith.subf %102, %105 : vector<8x8xf32>
    %107 = math.exp %106 : vector<8x8xf32>
    %cst_54 = arith.constant dense<0.000000e+00> : vector<8xf32>
    %108 = vector.multi_reduction <add>, %107, %cst_54 [1] : vector<8x8xf32> to vector<8xf32>
    %109 = vector.shape_cast %108 : vector<8xf32> to vector<8x1xf32>
    %110 = tpu.reciprocal %109 {approx = true} : vector<8x1xf32> -> vector<8x1xf32>
    %111 = vector.broadcast %110 : vector<8x1xf32> to vector<8x8xf32>
    %112 = arith.mulf %107, %111 : vector<8x8xf32>
    %113 = arith.truncf %112 : vector<8x8xf32> to vector<8x8xbf16>
    %cst_55 = arith.constant dense<0.000000e+00> : vector<8x16xf32>
    %114 = tpu.matmul %113, %97, %cst_55 {dimension_numbers = #tpu.dot_dimension_numbers<[1], [0], [0], [1], [0, 0, 1, 1], [], []>} : vector<8x8xbf16>, vector<8x16xbf16>, vector<8x16xf32> -> vector<8x16xf32>
    %c8_56 = arith.constant 8 : index
    %c0_57 = arith.constant 0 : index
    %115 = vector.load %arg20[%c8_56, %c0_57] : memref<16x32xf32, #tpu.memory_space<vmem>>, vector<8x16xf32>
    tpu.vector_store %arg20[%c8_56, %c0_57], %114 {strides = array<i32>} : memref<16x32xf32, #tpu.memory_space<vmem>>, vector<8x16xf32>,
    %c8_58 = arith.constant 8 : index
    %c16_59 = arith.constant 16 : index
    %116 = vector.load %arg19[%c8_58, %c16_59] : memref<16x96xf32, #tpu.memory_space<vmem>>, vector<8x16xf32>
    %117 = arith.truncf %116 : vector<8x16xf32> to vector<8x16xbf16>
    %c8_60 = arith.constant 8 : index
    %c48_61 = arith.constant 48 : index
    %118 = vector.load %arg19[%c8_60, %c48_61] : memref<16x96xf32, #tpu.memory_space<vmem>>, vector<8x16xf32>
    %119 = arith.truncf %118 : vector<8x16xf32> to vector<8x16xbf16>
    %c8_62 = arith.constant 8 : index
    %c80_63 = arith.constant 80 : index
    %120 = vector.load %arg19[%c8_62, %c80_63] : memref<16x96xf32, #tpu.memory_space<vmem>>, vector<8x16xf32>
    %121 = arith.truncf %120 : vector<8x16xf32> to vector<8x16xbf16>
    %cst_64 = arith.constant dense<0.000000e+00> : vector<8x8xf32>
    %122 = tpu.matmul %117, %119, %cst_64 {dimension_numbers = #tpu.dot_dimension_numbers<[1], [1], [0], [0], [0, 0, 1, 0], [], []>} : vector<8x16xbf16>, vector<8x16xbf16>, vector<8x8xf32> -> vector<8x8xf32>
    %cst_65 = arith.constant 2.500000e-01 : f32
    %123 = vector.broadcast %cst_65 : f32 to vector<8x8xf32>
    %124 = arith.mulf %122, %123 : vector<8x8xf32>
    %125 = vector.broadcast %91 : vector<1x8xf32> to vector<8x8xf32>
    %126 = arith.addf %124, %125 : vector<8x8xf32>
    %cst_66 = arith.constant dense<0xFF800000> : vector<8xf32>
    %127 = vector.multi_reduction <maximumf>, %126, %cst_66 [1] : vector<8x8xf32> to vector<8xf32>
    %128 = vector.shape_cast %127 : vector<8xf32> to vector<8x1xf32>
    %129 = vector.broadcast %128 : vector<8x1xf32> to vector<8x8xf32>
    %130 = arith.subf %126, %129 : vector<8x8xf32>
    %131 = math.exp %130 : vector<8x8xf32>
    %cst_67 = arith.constant dense<0.000000e+00> : vector<8xf32>
    %132 = vector.multi_reduction <add>, %131, %cst_67 [1] : vector<8x8xf32> to vector<8xf32>
    %133 = vector.shape_cast %132 : vector<8xf32> to vector<8x1xf32>
    %134 = tpu.reciprocal %133 {approx = true} : vector<8x1xf32> -> vector<8x1xf32>
    %135 = vector.broadcast %134 : vector<8x1xf32> to vector<8x8xf32>
    %136 = arith.mulf %131, %135 : vector<8x8xf32>
    %137 = arith.truncf %136 : vector<8x8xf32> to vector<8x8xbf16>
    %cst_68 = arith.constant dense<0.000000e+00> : vector<8x16xf32>
    %138 = tpu.matmul %137, %121, %cst_68 {dimension_numbers = #tpu.dot_dimension_numbers<[1], [0], [0], [1], [0, 0, 1, 1], [], []>} : vector<8x8xbf16>, vector<8x16xbf16>, vector<8x16xf32> -> vector<8x16xf32>
    %c8_69 = arith.constant 8 : index
    %c16_70 = arith.constant 16 : index
    %139 = vector.load %arg20[%c8_69, %c16_70] : memref<16x32xf32, #tpu.memory_space<vmem>>, vector<8x16xf32>
    tpu.vector_store %arg20[%c8_69, %c16_70], %138 {strides = array<i32>} : memref<16x32xf32, #tpu.memory_space<vmem>>, vector<8x16xf32>,
    %c0_71 = arith.constant 0 : index
    %c0_72 = arith.constant 0 : index
    %140 = vector.load %arg20[%c0_71, %c0_72] : memref<16x32xf32, #tpu.memory_space<vmem>>, vector<16x32xf32>
    %141 = arith.truncf %140 : vector<16x32xf32> to vector<16x32xbf16>
    %c0_73 = arith.constant 0 : index
    %c0_74 = arith.constant 0 : index
    %c0_75 = arith.constant 0 : index
    %142 = vector.load %arg6[%c0_73, %c0_74, %c0_75] : memref<2x32x32xbf16, #tpu.memory_space<vmem>>, vector<1x32x32xbf16>
    %143 = vector.shape_cast %142 : vector<1x32x32xbf16> to vector<32x32xbf16>
    %cst_76 = arith.constant dense<0.000000e+00> : vector<16x32xf32>
    %144 = tpu.matmul %141, %143, %cst_76 {dimension_numbers = #tpu.dot_dimension_numbers<[1], [0], [0], [1], [0, 0, 1, 1], [], []>} : vector<16x32xbf16>, vector<32x32xbf16>, vector<16x32xf32> -> vector<16x32xf32>
    %c0_77 = arith.constant 0 : index
    %c0_78 = arith.constant 0 : index
    %c0_79 = arith.constant 0 : index
    %145 = vector.load %arg7[%c0_77, %c0_78, %c0_79] : memref<2x1x32xf32, #tpu.memory_space<vmem>>, vector<1x1x32xf32>
    %146 = vector.shape_cast %145 : vector<1x1x32xf32> to vector<1x32xf32>
    %147 = vector.broadcast %146 : vector<1x32xf32> to vector<16x32xf32>
    %148 = arith.addf %144, %147 : vector<16x32xf32>
    %149 = arith.addf %148, %24 : vector<16x32xf32>
    %c0_80 = arith.constant 0 : index
    %c0_81 = arith.constant 0 : index
    %c0_82 = arith.constant 0 : index
    %150 = vector.load %arg8[%c0_80, %c0_81, %c0_82] : memref<2x1x32xf32, #tpu.memory_space<vmem>>, vector<1x1x32xf32>
    %151 = vector.shape_cast %150 : vector<1x1x32xf32> to vector<1x32xf32>
    %c0_83 = arith.constant 0 : index
    %c0_84 = arith.constant 0 : index
    %c0_85 = arith.constant 0 : index
    %152 = vector.load %arg9[%c0_83, %c0_84, %c0_85] : memref<2x1x32xf32, #tpu.memory_space<vmem>>, vector<1x1x32xf32>
    %153 = vector.shape_cast %152 : vector<1x1x32xf32> to vector<1x32xf32>
    %cst_86 = arith.constant dense<0.000000e+00> : vector<16xf32>
    %154 = vector.multi_reduction <add>, %149, %cst_86 [1] : vector<16x32xf32> to vector<16xf32>
    %155 = vector.shape_cast %154 : vector<16xf32> to vector<16x1xf32>
    %cst_87 = arith.constant 3.200000e+01 : f32
    %156 = vector.broadcast %cst_87 : f32 to vector<16x1xf32>
    %157 = arith.divf %155, %156 : vector<16x1xf32>
    %158 = vector.broadcast %157 : vector<16x1xf32> to vector<16x32xf32>
    %159 = arith.subf %149, %158 : vector<16x32xf32>
    %160 = arith.mulf %159, %159 : vector<16x32xf32>
    %cst_88 = arith.constant dense<0.000000e+00> : vector<16xf32>
    %161 = vector.multi_reduction <add>, %160, %cst_88 [1] : vector<16x32xf32> to vector<16xf32>
    %162 = vector.shape_cast %161 : vector<16xf32> to vector<16x1xf32>
    %cst_89 = arith.constant 3.200000e+01 : f32
    %163 = vector.broadcast %cst_89 : f32 to vector<16x1xf32>
    %164 = arith.divf %162, %163 : vector<16x1xf32>
    %165 = vector.broadcast %157 : vector<16x1xf32> to vector<16x32xf32>
    %166 = arith.subf %149, %165 : vector<16x32xf32>
    %cst_90 = arith.constant 9.99999996E-13 : f32
    %167 = vector.broadcast %cst_90 : f32 to vector<16x1xf32>
    %168 = arith.addf %164, %167 : vector<16x1xf32>
    %169 = math.rsqrt %168 : vector<16x1xf32>
    %170 = vector.broadcast %169 : vector<16x1xf32> to vector<16x32xf32>
    %171 = arith.mulf %166, %170 : vector<16x32xf32>
    %172 = vector.broadcast %151 : vector<1x32xf32> to vector<16x32xf32>
    %173 = arith.mulf %171, %172 : vector<16x32xf32>
    %174 = vector.broadcast %153 : vector<1x32xf32> to vector<16x32xf32>
    %175 = arith.addf %173, %174 : vector<16x32xf32>
    %176 = arith.truncf %175 : vector<16x32xf32> to vector<16x32xbf16>
    %c0_91 = arith.constant 0 : index
    %c0_92 = arith.constant 0 : index
    %c0_93 = arith.constant 0 : index
    %177 = vector.load %arg10[%c0_91, %c0_92, %c0_93] : memref<2x32x64xbf16, #tpu.memory_space<vmem>>, vector<1x32x64xbf16>
    %178 = vector.shape_cast %177 : vector<1x32x64xbf16> to vector<32x64xbf16>
    %cst_94 = arith.constant dense<0.000000e+00> : vector<16x64xf32>
    %179 = tpu.matmul %176, %178, %cst_94 {dimension_numbers = #tpu.dot_dimension_numbers<[1], [0], [0], [1], [0, 0, 1, 1], [], []>} : vector<16x32xbf16>, vector<32x64xbf16>, vector<16x64xf32> -> vector<16x64xf32>
    %c0_95 = arith.constant 0 : index
    %c0_96 = arith.constant 0 : index
    %c0_97 = arith.constant 0 : index
    %180 = vector.load %arg11[%c0_95, %c0_96, %c0_97] : memref<2x1x64xf32, #tpu.memory_space<vmem>>, vector<1x1x64xf32>
    %181 = vector.shape_cast %180 : vector<1x1x64xf32> to vector<1x64xf32>
    %182 = vector.broadcast %181 : vector<1x64xf32> to vector<16x64xf32>
    %183 = arith.addf %179, %182 : vector<16x64xf32>
    %cst_98 = arith.constant 5.000000e-01 : f32
    %184 = vector.broadcast %cst_98 : f32 to vector<16x64xf32>
    %185 = arith.mulf %184, %183 : vector<16x64xf32>
    %cst_99 = arith.constant 4.471500e-02 : f32
    %186 = vector.broadcast %cst_99 : f32 to vector<16x64xf32>
    %187 = arith.mulf %186, %183 : vector<16x64xf32>
    %188 = arith.mulf %187, %183 : vector<16x64xf32>
    %189 = arith.mulf %188, %183 : vector<16x64xf32>
    %190 = arith.addf %183, %189 : vector<16x64xf32>
    %cst_100 = arith.constant 0.797884583 : f32
    %191 = vector.broadcast %cst_100 : f32 to vector<16x64xf32>
    %192 = arith.mulf %191, %190 : vector<16x64xf32>
    %193 = math.tanh %192 : vector<16x64xf32>
    %cst_101 = arith.constant 1.000000e+00 : f32
    %194 = vector.broadcast %cst_101 : f32 to vector<16x64xf32>
    %195 = arith.addf %194, %193 : vector<16x64xf32>
    %196 = arith.mulf %185, %195 : vector<16x64xf32>
    %197 = arith.truncf %196 : vector<16x64xf32> to vector<16x64xbf16>
    %c0_102 = arith.constant 0 : index
    %c0_103 = arith.constant 0 : index
    %c0_104 = arith.constant 0 : index
    %198 = vector.load %arg12[%c0_102, %c0_103, %c0_104] : memref<2x64x32xbf16, #tpu.memory_space<vmem>>, vector<1x64x32xbf16>
    %199 = vector.shape_cast %198 : vector<1x64x32xbf16> to vector<64x32xbf16>
    %cst_105 = arith.constant dense<0.000000e+00> : vector<16x32xf32>
    %200 = tpu.matmul %197, %199, %cst_105 {dimension_numbers = #tpu.dot_dimension_numbers<[1], [0], [0], [1], [0, 0, 1, 1], [], []>} : vector<16x64xbf16>, vector<64x32xbf16>, vector<16x32xf32> -> vector<16x32xf32>
    %c0_106 = arith.constant 0 : index
    %c0_107 = arith.constant 0 : index
    %c0_108 = arith.constant 0 : index
    %201 = vector.load %arg13[%c0_106, %c0_107, %c0_108] : memref<2x1x32xf32, #tpu.memory_space<vmem>>, vector<1x1x32xf32>
    %202 = vector.shape_cast %201 : vector<1x1x32xf32> to vector<1x32xf32>
    %203 = vector.broadcast %202 : vector<1x32xf32> to vector<16x32xf32>
    %204 = arith.addf %200, %203 : vector<16x32xf32>
    %205 = arith.addf %204, %175 : vector<16x32xf32>
    %c0_109 = arith.constant 0 : index
    %c0_110 = arith.constant 0 : index
    %c0_111 = arith.constant 0 : index
    %206 = vector.load %arg14[%c0_109, %c0_110, %c0_111] : memref<2x1x32xf32, #tpu.memory_space<vmem>>, vector<1x1x32xf32>
    %207 = vector.shape_cast %206 : vector<1x1x32xf32> to vector<1x32xf32>
    %c0_112 = arith.constant 0 : index
    %c0_113 = arith.constant 0 : index
    %c0_114 = arith.constant 0 : index
    %208 = vector.load %arg15[%c0_112, %c0_113, %c0_114] : memref<2x1x32xf32, #tpu.memory_space<vmem>>, vector<1x1x32xf32>
    %209 = vector.shape_cast %208 : vector<1x1x32xf32> to vector<1x32xf32>
    %cst_115 = arith.constant dense<0.000000e+00> : vector<16xf32>
    %210 = vector.multi_reduction <add>, %205, %cst_115 [1] : vector<16x32xf32> to vector<16xf32>
    %211 = vector.shape_cast %210 : vector<16xf32> to vector<16x1xf32>
    %cst_116 = arith.constant 3.200000e+01 : f32
    %212 = vector.broadcast %cst_116 : f32 to vector<16x1xf32>
    %213 = arith.divf %211, %212 : vector<16x1xf32>
    %214 = vector.broadcast %213 : vector<16x1xf32> to vector<16x32xf32>
    %215 = arith.subf %205, %214 : vector<16x32xf32>
    %216 = arith.mulf %215, %215 : vector<16x32xf32>
    %cst_117 = arith.constant dense<0.000000e+00> : vector<16xf32>
    %217 = vector.multi_reduction <add>, %216, %cst_117 [1] : vector<16x32xf32> to vector<16xf32>
    %218 = vector.shape_cast %217 : vector<16xf32> to vector<16x1xf32>
    %cst_118 = arith.constant 3.200000e+01 : f32
    %219 = vector.broadcast %cst_118 : f32 to vector<16x1xf32>
    %220 = arith.divf %218, %219 : vector<16x1xf32>
    %221 = vector.broadcast %213 : vector<16x1xf32> to vector<16x32xf32>
    %222 = arith.subf %205, %221 : vector<16x32xf32>
    %cst_119 = arith.constant 9.99999996E-13 : f32
    %223 = vector.broadcast %cst_119 : f32 to vector<16x1xf32>
    %224 = arith.addf %220, %223 : vector<16x1xf32>
    %225 = math.rsqrt %224 : vector<16x1xf32>
    %226 = vector.broadcast %225 : vector<16x1xf32> to vector<16x32xf32>
    %227 = arith.mulf %222, %226 : vector<16x32xf32>
    %228 = vector.broadcast %207 : vector<1x32xf32> to vector<16x32xf32>
    %229 = arith.mulf %227, %228 : vector<16x32xf32>
    %230 = vector.broadcast %209 : vector<1x32xf32> to vector<16x32xf32>
    %231 = arith.addf %229, %230 : vector<16x32xf32>
    %232 = arith.truncf %231 : vector<16x32xf32> to vector<16x32xbf16>
    %c1_120 = arith.constant 1 : index
    %c0_121 = arith.constant 0 : index
    %c0_122 = arith.constant 0 : index
    %233 = vector.load %arg4[%c1_120, %c0_121, %c0_122] : memref<2x32x96xbf16, #tpu.memory_space<vmem>>, vector<1x32x96xbf16>
    %234 = vector.shape_cast %233 : vector<1x32x96xbf16> to vector<32x96xbf16>
    %cst_123 = arith.constant dense<0.000000e+00> : vector<16x96xf32>
    %235 = tpu.matmul %232, %234, %cst_123 {dimension_numbers = #tpu.dot_dimension_numbers<[1], [0], [0], [1], [0, 0, 1, 1], [], []>} : vector<16x32xbf16>, vector<32x96xbf16>, vector<16x96xf32> -> vector<16x96xf32>
    %c1_124 = arith.constant 1 : index
    %c0_125 = arith.constant 0 : index
    %c0_126 = arith.constant 0 : index
    %236 = vector.load %arg5[%c1_124, %c0_125, %c0_126] : memref<2x1x96xf32, #tpu.memory_space<vmem>>, vector<1x1x96xf32>
    %237 = vector.shape_cast %236 : vector<1x1x96xf32> to vector<1x96xf32>
    %238 = vector.broadcast %237 : vector<1x96xf32> to vector<16x96xf32>
    %239 = arith.addf %235, %238 : vector<16x96xf32>
    %c0_127 = arith.constant 0 : index
    %c0_128 = arith.constant 0 : index
    %240 = vector.load %arg19[%c0_127, %c0_128] : memref<16x96xf32, #tpu.memory_space<vmem>>, vector<16x96xf32>
    tpu.vector_store %arg19[%c0_127, %c0_128], %239 {strides = array<i32>} : memref<16x96xf32, #tpu.memory_space<vmem>>, vector<16x96xf32>,
    %c0_129 = arith.constant 0 : index
    %c0_130 = arith.constant 0 : index
    %241 = vector.load %arg1[%c0_129, %c0_130] : memref<2x8xf32, #tpu.memory_space<vmem>>, vector<1x8xf32>
    %cst_131 = arith.constant 1.000000e+00 : f32
    %242 = vector.broadcast %cst_131 : f32 to vector<1x8xf32>
    %243 = arith.subf %242, %241 : vector<1x8xf32>
    %cst_132 = arith.constant -1.000000e+09 : f32
    %244 = vector.broadcast %cst_132 : f32 to vector<1x8xf32>
    %245 = arith.mulf %243, %244 : vector<1x8xf32>
    %c0_133 = arith.constant 0 : index
    %c0_134 = arith.constant 0 : index
    %246 = vector.load %arg19[%c0_133, %c0_134] : memref<16x96xf32, #tpu.memory_space<vmem>>, vector<8x16xf32>
    %247 = arith.truncf %246 : vector<8x16xf32> to vector<8x16xbf16>
    %c0_135 = arith.constant 0 : index
    %c32_136 = arith.constant 32 : index
    %248 = vector.load %arg19[%c0_135, %c32_136] : memref<16x96xf32, #tpu.memory_space<vmem>>, vector<8x16xf32>
    %249 = arith.truncf %248 : vector<8x16xf32> to vector<8x16xbf16>
    %c0_137 = arith.constant 0 : index
    %c64_138 = arith.constant 64 : index
    %250 = vector.load %arg19[%c0_137, %c64_138] : memref<16x96xf32, #tpu.memory_space<vmem>>, vector<8x16xf32>
    %251 = arith.truncf %250 : vector<8x16xf32> to vector<8x16xbf16>
    %cst_139 = arith.constant dense<0.000000e+00> : vector<8x8xf32>
    %252 = tpu.matmul %247, %249, %cst_139 {dimension_numbers = #tpu.dot_dimension_numbers<[1], [1], [0], [0], [0, 0, 1, 0], [], []>} : vector<8x16xbf16>, vector<8x16xbf16>, vector<8x8xf32> -> vector<8x8xf32>
    %cst_140 = arith.constant 2.500000e-01 : f32
    %253 = vector.broadcast %cst_140 : f32 to vector<8x8xf32>
    %254 = arith.mulf %252, %253 : vector<8x8xf32>
    %255 = vector.broadcast %245 : vector<1x8xf32> to vector<8x8xf32>
    %256 = arith.addf %254, %255 : vector<8x8xf32>
    %cst_141 = arith.constant dense<0xFF800000> : vector<8xf32>
    %257 = vector.multi_reduction <maximumf>, %256, %cst_141 [1] : vector<8x8xf32> to vector<8xf32>
    %258 = vector.shape_cast %257 : vector<8xf32> to vector<8x1xf32>
    %259 = vector.broadcast %258 : vector<8x1xf32> to vector<8x8xf32>
    %260 = arith.subf %256, %259 : vector<8x8xf32>
    %261 = math.exp %260 : vector<8x8xf32>
    %cst_142 = arith.constant dense<0.000000e+00> : vector<8xf32>
    %262 = vector.multi_reduction <add>, %261, %cst_142 [1] : vector<8x8xf32> to vector<8xf32>
    %263 = vector.shape_cast %262 : vector<8xf32> to vector<8x1xf32>
    %264 = tpu.reciprocal %263 {approx = true} : vector<8x1xf32> -> vector<8x1xf32>
    %265 = vector.broadcast %264 : vector<8x1xf32> to vector<8x8xf32>
    %266 = arith.mulf %261, %265 : vector<8x8xf32>
    %267 = arith.truncf %266 : vector<8x8xf32> to vector<8x8xbf16>
    %cst_143 = arith.constant dense<0.000000e+00> : vector<8x16xf32>
    %268 = tpu.matmul %267, %251, %cst_143 {dimension_numbers = #tpu.dot_dimension_numbers<[1], [0], [0], [1], [0, 0, 1, 1], [], []>} : vector<8x8xbf16>, vector<8x16xbf16>, vector<8x16xf32> -> vector<8x16xf32>
    %c0_144 = arith.constant 0 : index
    %c0_145 = arith.constant 0 : index
    %269 = vector.load %arg20[%c0_144, %c0_145] : memref<16x32xf32, #tpu.memory_space<vmem>>, vector<8x16xf32>
    tpu.vector_store %arg20[%c0_144, %c0_145], %268 {strides = array<i32>} : memref<16x32xf32, #tpu.memory_space<vmem>>, vector<8x16xf32>,
    %c0_146 = arith.constant 0 : index
    %c16_147 = arith.constant 16 : index
    %270 = vector.load %arg19[%c0_146, %c16_147] : memref<16x96xf32, #tpu.memory_space<vmem>>, vector<8x16xf32>
    %271 = arith.truncf %270 : vector<8x16xf32> to vector<8x16xbf16>
    %c0_148 = arith.constant 0 : index
    %c48_149 = arith.constant 48 : index
    %272 = vector.load %arg19[%c0_148, %c48_149] : memref<16x96xf32, #tpu.memory_space<vmem>>, vector<8x16xf32>
    %273 = arith.truncf %272 : vector<8x16xf32> to vector<8x16xbf16>
    %c0_150 = arith.constant 0 : index
    %c80_151 = arith.constant 80 : index
    %274 = vector.load %arg19[%c0_150, %c80_151] : memref<16x96xf32, #tpu.memory_space<vmem>>, vector<8x16xf32>
    %275 = arith.truncf %274 : vector<8x16xf32> to vector<8x16xbf16>
    %cst_152 = arith.constant dense<0.000000e+00> : vector<8x8xf32>
    %276 = tpu.matmul %271, %273, %cst_152 {dimension_numbers = #tpu.dot_dimension_numbers<[1], [1], [0], [0], [0, 0, 1, 0], [], []>} : vector<8x16xbf16>, vector<8x16xbf16>, vector<8x8xf32> -> vector<8x8xf32>
    %cst_153 = arith.constant 2.500000e-01 : f32
    %277 = vector.broadcast %cst_153 : f32 to vector<8x8xf32>
    %278 = arith.mulf %276, %277 : vector<8x8xf32>
    %279 = vector.broadcast %245 : vector<1x8xf32> to vector<8x8xf32>
    %280 = arith.addf %278, %279 : vector<8x8xf32>
    %cst_154 = arith.constant dense<0xFF800000> : vector<8xf32>
    %281 = vector.multi_reduction <maximumf>, %280, %cst_154 [1] : vector<8x8xf32> to vector<8xf32>
    %282 = vector.shape_cast %281 : vector<8xf32> to vector<8x1xf32>
    %283 = vector.broadcast %282 : vector<8x1xf32> to vector<8x8xf32>
    %284 = arith.subf %280, %283 : vector<8x8xf32>
    %285 = math.exp %284 : vector<8x8xf32>
    %cst_155 = arith.constant dense<0.000000e+00> : vector<8xf32>
    %286 = vector.multi_reduction <add>, %285, %cst_155 [1] : vector<8x8xf32> to vector<8xf32>
    %287 = vector.shape_cast %286 : vector<8xf32> to vector<8x1xf32>
    %288 = tpu.reciprocal %287 {approx = true} : vector<8x1xf32> -> vector<8x1xf32>
    %289 = vector.broadcast %288 : vector<8x1xf32> to vector<8x8xf32>
    %290 = arith.mulf %285, %289 : vector<8x8xf32>
    %291 = arith.truncf %290 : vector<8x8xf32> to vector<8x8xbf16>
    %cst_156 = arith.constant dense<0.000000e+00> : vector<8x16xf32>
    %292 = tpu.matmul %291, %275, %cst_156 {dimension_numbers = #tpu.dot_dimension_numbers<[1], [0], [0], [1], [0, 0, 1, 1], [], []>} : vector<8x8xbf16>, vector<8x16xbf16>, vector<8x16xf32> -> vector<8x16xf32>
    %c0_157 = arith.constant 0 : index
    %c16_158 = arith.constant 16 : index
    %293 = vector.load %arg20[%c0_157, %c16_158] : memref<16x32xf32, #tpu.memory_space<vmem>>, vector<8x16xf32>
    tpu.vector_store %arg20[%c0_157, %c16_158], %292 {strides = array<i32>} : memref<16x32xf32, #tpu.memory_space<vmem>>, vector<8x16xf32>,
    %c1_159 = arith.constant 1 : index
    %c0_160 = arith.constant 0 : index
    %294 = vector.load %arg1[%c1_159, %c0_160] : memref<2x8xf32, #tpu.memory_space<vmem>>, vector<1x8xf32>
    %cst_161 = arith.constant 1.000000e+00 : f32
    %295 = vector.broadcast %cst_161 : f32 to vector<1x8xf32>
    %296 = arith.subf %295, %294 : vector<1x8xf32>
    %cst_162 = arith.constant -1.000000e+09 : f32
    %297 = vector.broadcast %cst_162 : f32 to vector<1x8xf32>
    %298 = arith.mulf %296, %297 : vector<1x8xf32>
    %c8_163 = arith.constant 8 : index
    %c0_164 = arith.constant 0 : index
    %299 = vector.load %arg19[%c8_163, %c0_164] : memref<16x96xf32, #tpu.memory_space<vmem>>, vector<8x16xf32>
    %300 = arith.truncf %299 : vector<8x16xf32> to vector<8x16xbf16>
    %c8_165 = arith.constant 8 : index
    %c32_166 = arith.constant 32 : index
    %301 = vector.load %arg19[%c8_165, %c32_166] : memref<16x96xf32, #tpu.memory_space<vmem>>, vector<8x16xf32>
    %302 = arith.truncf %301 : vector<8x16xf32> to vector<8x16xbf16>
    %c8_167 = arith.constant 8 : index
    %c64_168 = arith.constant 64 : index
    %303 = vector.load %arg19[%c8_167, %c64_168] : memref<16x96xf32, #tpu.memory_space<vmem>>, vector<8x16xf32>
    %304 = arith.truncf %303 : vector<8x16xf32> to vector<8x16xbf16>
    %cst_169 = arith.constant dense<0.000000e+00> : vector<8x8xf32>
    %305 = tpu.matmul %300, %302, %cst_169 {dimension_numbers = #tpu.dot_dimension_numbers<[1], [1], [0], [0], [0, 0, 1, 0], [], []>} : vector<8x16xbf16>, vector<8x16xbf16>, vector<8x8xf32> -> vector<8x8xf32>
    %cst_170 = arith.constant 2.500000e-01 : f32
    %306 = vector.broadcast %cst_170 : f32 to vector<8x8xf32>
    %307 = arith.mulf %305, %306 : vector<8x8xf32>
    %308 = vector.broadcast %298 : vector<1x8xf32> to vector<8x8xf32>
    %309 = arith.addf %307, %308 : vector<8x8xf32>
    %cst_171 = arith.constant dense<0xFF800000> : vector<8xf32>
    %310 = vector.multi_reduction <maximumf>, %309, %cst_171 [1] : vector<8x8xf32> to vector<8xf32>
    %311 = vector.shape_cast %310 : vector<8xf32> to vector<8x1xf32>
    %312 = vector.broadcast %311 : vector<8x1xf32> to vector<8x8xf32>
    %313 = arith.subf %309, %312 : vector<8x8xf32>
    %314 = math.exp %313 : vector<8x8xf32>
    %cst_172 = arith.constant dense<0.000000e+00> : vector<8xf32>
    %315 = vector.multi_reduction <add>, %314, %cst_172 [1] : vector<8x8xf32> to vector<8xf32>
    %316 = vector.shape_cast %315 : vector<8xf32> to vector<8x1xf32>
    %317 = tpu.reciprocal %316 {approx = true} : vector<8x1xf32> -> vector<8x1xf32>
    %318 = vector.broadcast %317 : vector<8x1xf32> to vector<8x8xf32>
    %319 = arith.mulf %314, %318 : vector<8x8xf32>
    %320 = arith.truncf %319 : vector<8x8xf32> to vector<8x8xbf16>
    %cst_173 = arith.constant dense<0.000000e+00> : vector<8x16xf32>
    %321 = tpu.matmul %320, %304, %cst_173 {dimension_numbers = #tpu.dot_dimension_numbers<[1], [0], [0], [1], [0, 0, 1, 1], [], []>} : vector<8x8xbf16>, vector<8x16xbf16>, vector<8x16xf32> -> vector<8x16xf32>
    %c8_174 = arith.constant 8 : index
    %c0_175 = arith.constant 0 : index
    %322 = vector.load %arg20[%c8_174, %c0_175] : memref<16x32xf32, #tpu.memory_space<vmem>>, vector<8x16xf32>
    tpu.vector_store %arg20[%c8_174, %c0_175], %321 {strides = array<i32>} : memref<16x32xf32, #tpu.memory_space<vmem>>, vector<8x16xf32>,
    %c8_176 = arith.constant 8 : index
    %c16_177 = arith.constant 16 : index
    %323 = vector.load %arg19[%c8_176, %c16_177] : memref<16x96xf32, #tpu.memory_space<vmem>>, vector<8x16xf32>
    %324 = arith.truncf %323 : vector<8x16xf32> to vector<8x16xbf16>
    %c8_178 = arith.constant 8 : index
    %c48_179 = arith.constant 48 : index
    %325 = vector.load %arg19[%c8_178, %c48_179] : memref<16x96xf32, #tpu.memory_space<vmem>>, vector<8x16xf32>
    %326 = arith.truncf %325 : vector<8x16xf32> to vector<8x16xbf16>
    %c8_180 = arith.constant 8 : index
    %c80_181 = arith.constant 80 : index
    %327 = vector.load %arg19[%c8_180, %c80_181] : memref<16x96xf32, #tpu.memory_space<vmem>>, vector<8x16xf32>
    %328 = arith.truncf %327 : vector<8x16xf32> to vector<8x16xbf16>
    %cst_182 = arith.constant dense<0.000000e+00> : vector<8x8xf32>
    %329 = tpu.matmul %324, %326, %cst_182 {dimension_numbers = #tpu.dot_dimension_numbers<[1], [1], [0], [0], [0, 0, 1, 0], [], []>} : vector<8x16xbf16>, vector<8x16xbf16>, vector<8x8xf32> -> vector<8x8xf32>
    %cst_183 = arith.constant 2.500000e-01 : f32
    %330 = vector.broadcast %cst_183 : f32 to vector<8x8xf32>
    %331 = arith.mulf %329, %330 : vector<8x8xf32>
    %332 = vector.broadcast %298 : vector<1x8xf32> to vector<8x8xf32>
    %333 = arith.addf %331, %332 : vector<8x8xf32>
    %cst_184 = arith.constant dense<0xFF800000> : vector<8xf32>
    %334 = vector.multi_reduction <maximumf>, %333, %cst_184 [1] : vector<8x8xf32> to vector<8xf32>
    %335 = vector.shape_cast %334 : vector<8xf32> to vector<8x1xf32>
    %336 = vector.broadcast %335 : vector<8x1xf32> to vector<8x8xf32>
    %337 = arith.subf %333, %336 : vector<8x8xf32>
    %338 = math.exp %337 : vector<8x8xf32>
    %cst_185 = arith.constant dense<0.000000e+00> : vector<8xf32>
    %339 = vector.multi_reduction <add>, %338, %cst_185 [1] : vector<8x8xf32> to vector<8xf32>
    %340 = vector.shape_cast %339 : vector<8xf32> to vector<8x1xf32>
    %341 = tpu.reciprocal %340 {approx = true} : vector<8x1xf32> -> vector<8x1xf32>
    %342 = vector.broadcast %341 : vector<8x1xf32> to vector<8x8xf32>
    %343 = arith.mulf %338, %342 : vector<8x8xf32>
    %344 = arith.truncf %343 : vector<8x8xf32> to vector<8x8xbf16>
    %cst_186 = arith.constant dense<0.000000e+00> : vector<8x16xf32>
    %345 = tpu.matmul %344, %328, %cst_186 {dimension_numbers = #tpu.dot_dimension_numbers<[1], [0], [0], [1], [0, 0, 1, 1], [], []>} : vector<8x8xbf16>, vector<8x16xbf16>, vector<8x16xf32> -> vector<8x16xf32>
    %c8_187 = arith.constant 8 : index
    %c16_188 = arith.constant 16 : index
    %346 = vector.load %arg20[%c8_187, %c16_188] : memref<16x32xf32, #tpu.memory_space<vmem>>, vector<8x16xf32>
    tpu.vector_store %arg20[%c8_187, %c16_188], %345 {strides = array<i32>} : memref<16x32xf32, #tpu.memory_space<vmem>>, vector<8x16xf32>,
    %c0_189 = arith.constant 0 : index
    %c0_190 = arith.constant 0 : index
    %347 = vector.load %arg20[%c0_189, %c0_190] : memref<16x32xf32, #tpu.memory_space<vmem>>, vector<16x32xf32>
    %348 = arith.truncf %347 : vector<16x32xf32> to vector<16x32xbf16>
    %c1_191 = arith.constant 1 : index
    %c0_192 = arith.constant 0 : index
    %c0_193 = arith.constant 0 : index
    %349 = vector.load %arg6[%c1_191, %c0_192, %c0_193] : memref<2x32x32xbf16, #tpu.memory_space<vmem>>, vector<1x32x32xbf16>
    %350 = vector.shape_cast %349 : vector<1x32x32xbf16> to vector<32x32xbf16>
    %cst_194 = arith.constant dense<0.000000e+00> : vector<16x32xf32>
    %351 = tpu.matmul %348, %350, %cst_194 {dimension_numbers = #tpu.dot_dimension_numbers<[1], [0], [0], [1], [0, 0, 1, 1], [], []>} : vector<16x32xbf16>, vector<32x32xbf16>, vector<16x32xf32> -> vector<16x32xf32>
    %c1_195 = arith.constant 1 : index
    %c0_196 = arith.constant 0 : index
    %c0_197 = arith.constant 0 : index
    %352 = vector.load %arg7[%c1_195, %c0_196, %c0_197] : memref<2x1x32xf32, #tpu.memory_space<vmem>>, vector<1x1x32xf32>
    %353 = vector.shape_cast %352 : vector<1x1x32xf32> to vector<1x32xf32>
    %354 = vector.broadcast %353 : vector<1x32xf32> to vector<16x32xf32>
    %355 = arith.addf %351, %354 : vector<16x32xf32>
    %356 = arith.addf %355, %231 : vector<16x32xf32>
    %c1_198 = arith.constant 1 : index
    %c0_199 = arith.constant 0 : index
    %c0_200 = arith.constant 0 : index
    %357 = vector.load %arg8[%c1_198, %c0_199, %c0_200] : memref<2x1x32xf32, #tpu.memory_space<vmem>>, vector<1x1x32xf32>
    %358 = vector.shape_cast %357 : vector<1x1x32xf32> to vector<1x32xf32>
    %c1_201 = arith.constant 1 : index
    %c0_202 = arith.constant 0 : index
    %c0_203 = arith.constant 0 : index
    %359 = vector.load %arg9[%c1_201, %c0_202, %c0_203] : memref<2x1x32xf32, #tpu.memory_space<vmem>>, vector<1x1x32xf32>
    %360 = vector.shape_cast %359 : vector<1x1x32xf32> to vector<1x32xf32>
    %cst_204 = arith.constant dense<0.000000e+00> : vector<16xf32>
    %361 = vector.multi_reduction <add>, %356, %cst_204 [1] : vector<16x32xf32> to vector<16xf32>
    %362 = vector.shape_cast %361 : vector<16xf32> to vector<16x1xf32>
    %cst_205 = arith.constant 3.200000e+01 : f32
    %363 = vector.broadcast %cst_205 : f32 to vector<16x1xf32>
    %364 = arith.divf %362, %363 : vector<16x1xf32>
    %365 = vector.broadcast %364 : vector<16x1xf32> to vector<16x32xf32>
    %366 = arith.subf %356, %365 : vector<16x32xf32>
    %367 = arith.mulf %366, %366 : vector<16x32xf32>
    %cst_206 = arith.constant dense<0.000000e+00> : vector<16xf32>
    %368 = vector.multi_reduction <add>, %367, %cst_206 [1] : vector<16x32xf32> to vector<16xf32>
    %369 = vector.shape_cast %368 : vector<16xf32> to vector<16x1xf32>
    %cst_207 = arith.constant 3.200000e+01 : f32
    %370 = vector.broadcast %cst_207 : f32 to vector<16x1xf32>
    %371 = arith.divf %369, %370 : vector<16x1xf32>
    %372 = vector.broadcast %364 : vector<16x1xf32> to vector<16x32xf32>
    %373 = arith.subf %356, %372 : vector<16x32xf32>
    %cst_208 = arith.constant 9.99999996E-13 : f32
    %374 = vector.broadcast %cst_208 : f32 to vector<16x1xf32>
    %375 = arith.addf %371, %374 : vector<16x1xf32>
    %376 = math.rsqrt %375 : vector<16x1xf32>
    %377 = vector.broadcast %376 : vector<16x1xf32> to vector<16x32xf32>
    %378 = arith.mulf %373, %377 : vector<16x32xf32>
    %379 = vector.broadcast %358 : vector<1x32xf32> to vector<16x32xf32>
    %380 = arith.mulf %378, %379 : vector<16x32xf32>
    %381 = vector.broadcast %360 : vector<1x32xf32> to vector<16x32xf32>
    %382 = arith.addf %380, %381 : vector<16x32xf32>
    %383 = arith.truncf %382 : vector<16x32xf32> to vector<16x32xbf16>
    %c1_209 = arith.constant 1 : index
    %c0_210 = arith.constant 0 : index
    %c0_211 = arith.constant 0 : index
    %384 = vector.load %arg10[%c1_209, %c0_210, %c0_211] : memref<2x32x64xbf16, #tpu.memory_space<vmem>>, vector<1x32x64xbf16>
    %385 = vector.shape_cast %384 : vector<1x32x64xbf16> to vector<32x64xbf16>
    %cst_212 = arith.constant dense<0.000000e+00> : vector<16x64xf32>
    %386 = tpu.matmul %383, %385, %cst_212 {dimension_numbers = #tpu.dot_dimension_numbers<[1], [0], [0], [1], [0, 0, 1, 1], [], []>} : vector<16x32xbf16>, vector<32x64xbf16>, vector<16x64xf32> -> vector<16x64xf32>
    %c1_213 = arith.constant 1 : index
    %c0_214 = arith.constant 0 : index
    %c0_215 = arith.constant 0 : index
    %387 = vector.load %arg11[%c1_213, %c0_214, %c0_215] : memref<2x1x64xf32, #tpu.memory_space<vmem>>, vector<1x1x64xf32>
    %388 = vector.shape_cast %387 : vector<1x1x64xf32> to vector<1x64xf32>
    %389 = vector.broadcast %388 : vector<1x64xf32> to vector<16x64xf32>
    %390 = arith.addf %386, %389 : vector<16x64xf32>
    %cst_216 = arith.constant 5.000000e-01 : f32
    %391 = vector.broadcast %cst_216 : f32 to vector<16x64xf32>
    %392 = arith.mulf %391, %390 : vector<16x64xf32>
    %cst_217 = arith.constant 4.471500e-02 : f32
    %393 = vector.broadcast %cst_217 : f32 to vector<16x64xf32>
    %394 = arith.mulf %393, %390 : vector<16x64xf32>
    %395 = arith.mulf %394, %390 : vector<16x64xf32>
    %396 = arith.mulf %395, %390 : vector<16x64xf32>
    %397 = arith.addf %390, %396 : vector<16x64xf32>
    %cst_218 = arith.constant 0.797884583 : f32
    %398 = vector.broadcast %cst_218 : f32 to vector<16x64xf32>
    %399 = arith.mulf %398, %397 : vector<16x64xf32>
    %400 = math.tanh %399 : vector<16x64xf32>
    %cst_219 = arith.constant 1.000000e+00 : f32
    %401 = vector.broadcast %cst_219 : f32 to vector<16x64xf32>
    %402 = arith.addf %401, %400 : vector<16x64xf32>
    %403 = arith.mulf %392, %402 : vector<16x64xf32>
    %404 = arith.truncf %403 : vector<16x64xf32> to vector<16x64xbf16>
    %c1_220 = arith.constant 1 : index
    %c0_221 = arith.constant 0 : index
    %c0_222 = arith.constant 0 : index
    %405 = vector.load %arg12[%c1_220, %c0_221, %c0_222] : memref<2x64x32xbf16, #tpu.memory_space<vmem>>, vector<1x64x32xbf16>
    %406 = vector.shape_cast %405 : vector<1x64x32xbf16> to vector<64x32xbf16>
    %cst_223 = arith.constant dense<0.000000e+00> : vector<16x32xf32>
    %407 = tpu.matmul %404, %406, %cst_223 {dimension_numbers = #tpu.dot_dimension_numbers<[1], [0], [0], [1], [0, 0, 1, 1], [], []>} : vector<16x64xbf16>, vector<64x32xbf16>, vector<16x32xf32> -> vector<16x32xf32>
    %c1_224 = arith.constant 1 : index
    %c0_225 = arith.constant 0 : index
    %c0_226 = arith.constant 0 : index
    %408 = vector.load %arg13[%c1_224, %c0_225, %c0_226] : memref<2x1x32xf32, #tpu.memory_space<vmem>>, vector<1x1x32xf32>
    %409 = vector.shape_cast %408 : vector<1x1x32xf32> to vector<1x32xf32>
    %410 = vector.broadcast %409 : vector<1x32xf32> to vector<16x32xf32>
    %411 = arith.addf %407, %410 : vector<16x32xf32>
    %412 = arith.addf %411, %382 : vector<16x32xf32>
    %c1_227 = arith.constant 1 : index
    %c0_228 = arith.constant 0 : index
    %c0_229 = arith.constant 0 : index
    %413 = vector.load %arg14[%c1_227, %c0_228, %c0_229] : memref<2x1x32xf32, #tpu.memory_space<vmem>>, vector<1x1x32xf32>
    %414 = vector.shape_cast %413 : vector<1x1x32xf32> to vector<1x32xf32>
    %c1_230 = arith.constant 1 : index
    %c0_231 = arith.constant 0 : index
    %c0_232 = arith.constant 0 : index
    %415 = vector.load %arg15[%c1_230, %c0_231, %c0_232] : memref<2x1x32xf32, #tpu.memory_space<vmem>>, vector<1x1x32xf32>
    %416 = vector.shape_cast %415 : vector<1x1x32xf32> to vector<1x32xf32>
    %cst_233 = arith.constant dense<0.000000e+00> : vector<16xf32>
    %417 = vector.multi_reduction <add>, %412, %cst_233 [1] : vector<16x32xf32> to vector<16xf32>
    %418 = vector.shape_cast %417 : vector<16xf32> to vector<16x1xf32>
    %cst_234 = arith.constant 3.200000e+01 : f32
    %419 = vector.broadcast %cst_234 : f32 to vector<16x1xf32>
    %420 = arith.divf %418, %419 : vector<16x1xf32>
    %421 = vector.broadcast %420 : vector<16x1xf32> to vector<16x32xf32>
    %422 = arith.subf %412, %421 : vector<16x32xf32>
    %423 = arith.mulf %422, %422 : vector<16x32xf32>
    %cst_235 = arith.constant dense<0.000000e+00> : vector<16xf32>
    %424 = vector.multi_reduction <add>, %423, %cst_235 [1] : vector<16x32xf32> to vector<16xf32>
    %425 = vector.shape_cast %424 : vector<16xf32> to vector<16x1xf32>
    %cst_236 = arith.constant 3.200000e+01 : f32
    %426 = vector.broadcast %cst_236 : f32 to vector<16x1xf32>
    %427 = arith.divf %425, %426 : vector<16x1xf32>
    %428 = vector.broadcast %420 : vector<16x1xf32> to vector<16x32xf32>
    %429 = arith.subf %412, %428 : vector<16x32xf32>
    %cst_237 = arith.constant 9.99999996E-13 : f32
    %430 = vector.broadcast %cst_237 : f32 to vector<16x1xf32>
    %431 = arith.addf %427, %430 : vector<16x1xf32>
    %432 = math.rsqrt %431 : vector<16x1xf32>
    %433 = vector.broadcast %432 : vector<16x1xf32> to vector<16x32xf32>
    %434 = arith.mulf %429, %433 : vector<16x32xf32>
    %435 = vector.broadcast %414 : vector<1x32xf32> to vector<16x32xf32>
    %436 = arith.mulf %434, %435 : vector<16x32xf32>
    %437 = vector.broadcast %416 : vector<1x32xf32> to vector<16x32xf32>
    %438 = arith.addf %436, %437 : vector<16x32xf32>
    %c0_238 = arith.constant 0 : index
    %c0_239 = arith.constant 0 : index
    %439 = vector.load %arg20[%c0_238, %c0_239] : memref<16x32xf32, #tpu.memory_space<vmem>>, vector<16x32xf32>
    tpu.vector_store %arg20[%c0_238, %c0_239], %438 {strides = array<i32>} : memref<16x32xf32, #tpu.memory_space<vmem>>, vector<16x32xf32>,
    %c0_240 = arith.constant 0 : index
    %c0_241 = arith.constant 0 : index
    %440 = vector.load %arg16[%c0_240, %c0_241] : memref<64x3xf32, #tpu.memory_space<vmem>>, vector<64x3xf32>
    %c0_242 = arith.constant 0 : index
    %c0_243 = arith.constant 0 : index
    %441 = vector.load %arg17[%c0_242, %c0_243] : memref<1x3xf32, #tpu.memory_space<vmem>>, vector<1x3xf32>
    %c0_244 = arith.constant 0 : index
    %c0_245 = arith.constant 0 : index
    %442 = vector.load %arg20[%c0_244, %c0_245] : memref<16x32xf32, #tpu.memory_space<vmem>>, vector<1x32xf32>
    %c7 = arith.constant 7 : index
    %c0_246 = arith.constant 0 : index
    %443 = vector.load %arg20[%c7, %c0_246] : memref<16x32xf32, #tpu.memory_space<vmem>>, vector<1x32xf32>
    %444 = vector.extract_strided_slice %440 {offsets = [0, 0], sizes = [32, 3], strides = [1, 1]} : vector<64x3xf32> to vector<32x3xf32>
    %cst_247 = arith.constant dense<0.000000e+00> : vector<1x3xf32>
    %445 = tpu.matmul %442, %444, %cst_247 {dimension_numbers = #tpu.dot_dimension_numbers<[1], [0], [0], [1], [0, 0, 1, 1], [], []>} : vector<1x32xf32>, vector<32x3xf32>, vector<1x3xf32> -> vector<1x3xf32>
    %446 = vector.extract_strided_slice %440 {offsets = [32, 0], sizes = [32, 3], strides = [1, 1]} : vector<64x3xf32> to vector<32x3xf32>
    %cst_248 = arith.constant dense<0.000000e+00> : vector<1x3xf32>
    %447 = tpu.matmul %443, %446, %cst_248 {dimension_numbers = #tpu.dot_dimension_numbers<[1], [0], [0], [1], [0, 0, 1, 1], [], []>} : vector<1x32xf32>, vector<32x3xf32>, vector<1x3xf32> -> vector<1x3xf32>
    %448 = arith.addf %445, %447 : vector<1x3xf32>
    %449 = arith.addf %448, %441 : vector<1x3xf32>
    %c0_249 = arith.constant 0 : index
    %c0_250 = arith.constant 0 : index
    %450 = vector.load %arg18[%c0_249, %c0_250] : memref<2x3xf32, #tpu.memory_space<vmem>>, vector<1x3xf32>
    tpu.vector_store %arg18[%c0_249, %c0_250], %449 {strides = array<i32>} : memref<2x3xf32, #tpu.memory_space<vmem>>, vector<1x3xf32>,
    %c8_251 = arith.constant 8 : index
    %c0_252 = arith.constant 0 : index
    %451 = vector.load %arg20[%c8_251, %c0_252] : memref<16x32xf32, #tpu.memory_space<vmem>>, vector<1x32xf32>
    %c15 = arith.constant 15 : index
    %c0_253 = arith.constant 0 : index
    %452 = vector.load %arg20[%c15, %c0_253] : memref<16x32xf32, #tpu.memory_space<vmem>>, vector<1x32xf32>
    %453 = vector.extract_strided_slice %440 {offsets = [0, 0], sizes = [32, 3], strides = [1, 1]} : vector<64x3xf32> to vector<32x3xf32>
    %cst_254 = arith.constant dense<0.000000e+00> : vector<1x3xf32>
    %454 = tpu.matmul %451, %453, %cst_254 {dimension_numbers = #tpu.dot_dimension_numbers<[1], [0], [0], [1], [0, 0, 1, 1], [], []>} : vector<1x32xf32>, vector<32x3xf32>, vector<1x3xf32> -> vector<1x3xf32>
    %455 = vector.extract_strided_slice %440 {offsets = [32, 0], sizes = [32, 3], strides = [1, 1]} : vector<64x3xf32> to vector<32x3xf32>
    %cst_255 = arith.constant dense<0.000000e+00> : vector<1x3xf32>
    %456 = tpu.matmul %452, %455, %cst_255 {dimension_numbers = #tpu.dot_dimension_numbers<[1], [0], [0], [1], [0, 0, 1, 1], [], []>} : vector<1x32xf32>, vector<32x3xf32>, vector<1x3xf32> -> vector<1x3xf32>
    %457 = arith.addf %454, %456 : vector<1x3xf32>
    %458 = arith.addf %457, %441 : vector<1x3xf32>
    %c1_256 = arith.constant 1 : index
    %c0_257 = arith.constant 0 : index
    %459 = vector.load %arg18[%c1_256, %c0_257] : memref<2x3xf32, #tpu.memory_space<vmem>>, vector<1x3xf32>
    tpu.vector_store %arg18[%c1_256, %c0_257], %458 {strides = array<i32>} : memref<2x3xf32, #tpu.memory_space<vmem>>, vector<1x3xf32>,
    return
  }
}

</mosaic_0001>

<bundles_post_ra>
// kernel: bert_classify.1
= control target key start
LH: loop header
LB: loop body
LE: loop exit
PB: predicated region body
PF: predicated region fallthrough
CT: control target
= control target key end

     0   :  { %s2113_s0 = inlined_call_operand.vmem [shape: f32[16,32], index: 0, kind: input, shape index: {}]   ;;  %s2114_s1 = inlined_call_operand.vmem [shape: f32[2,8], index: 1, kind: input, shape index: {}]   ;;  %s2115_s2 = inlined_call_operand.vmem [shape: f32[1,32], index: 2, kind: input, shape index: {}]   ;;  %s2116_s3 = inlined_call_operand.vmem [shape: f32[1,32], index: 3, kind: input, shape index: {}]   ;;  %s2117_s4 = inlined_call_operand.vmem [shape: bf16[2,32,96], index: 4, kind: input, shape index: {}]   ;;  %s2118_s5 = inlined_call_operand.vmem [shape: f32[2,1,96], index: 5, kind: input, shape index: {}]   ;;  %s2119_s6 = inlined_call_operand.vmem [shape: bf16[2,32,32], index: 6, kind: input, shape index: {}]   ;;  %s2120_s7 = inlined_call_operand.vmem [shape: f32[2,1,32], index: 7, kind: input, shape index: {}]   ;;  %s2121_s8 = inlined_call_operand.vmem [shape: f32[2,1,32], index: 8, kind: input, shape index: {}]   ;;  %s2122_s9 = inlined_call_operand.vmem [shape: f32[2,1,32], index: 9, kind: input, shape index: {}]   ;;  %s2123_s10 = inlined_call_operand.vmem [shape: bf16[2,32,64], index: 10, kind: input, shape index: {}]   ;;  %s2124_s11 = inlined_call_operand.vmem [shape: f32[2,1,64], index: 11, kind: input, shape index: {}]   ;;  %s2125_s12 = inlined_call_operand.vmem [shape: bf16[2,64,32], index: 12, kind: input, shape index: {}]   ;;  %s2126_s13 = inlined_call_operand.vmem [shape: f32[2,1,32], index: 13, kind: input, shape index: {}]   ;;  %s2127_s14 = inlined_call_operand.vmem [shape: f32[2,1,32], index: 14, kind: input, shape index: {}]   ;;  %s2128_s15 = inlined_call_operand.vmem [shape: f32[2,1,32], index: 15, kind: input, shape index: {}]   ;;  %s2129_s16 = inlined_call_operand.vmem [shape: f32[64,3], index: 16, kind: input, shape index: {}]   ;;  %s2130_s17 = inlined_call_operand.vmem [shape: f32[1,3], index: 17, kind: input, shape index: {}]   ;;  %s2131_s18 = inlined_call_operand.hbm [shape: f32[2,3], index: 18, kind: output, shape index: {}]  }
   0x1   :  { %2136 = sst [smem:[#allocation7_spill]] %s2113_s0 }
   0x2   :  { %2137 = sst [smem:[#allocation8_spill]] %s2114_s1 }
   0x3   :  { %2138 = sst [smem:[#allocation9_spill]] %s2115_s2 }
   0x4   :  { %s2139_s29 = sld [smem:[#allocation7_spill]]  ;;  %vm65_vm0 = vcmask 261120  }
   0xa   :  { %v61_v0 = vld [vmem:[%s2139_s29] sm:$0xff]  ;;  %v62_v2 = vld [vmem:[%s2139_s29 + $0x8] sm:$0xff] }
   0xb   :  { %v66_v1 = vsel %vm65_vm0, %v61_v0, 0.0  ;;  %v69_v3 = vsel %vm65_vm0, %v62_v2, 0.0 }
   0xc   :  { %67 = vadd.xlane.f32.xlu0 %v66_v1 }
   0xd   :  { %23 = vsyncpa [#allocation5], 0  ;;  %v1675_v4 = vmov 32.0   ;;  %v1542_v21 = vld [vmem:[%s2117_s4 + $0x8] sm:$0xff]  ;;  %v1541_v23 = vld [vmem:[%s2117_s4] sm:$0xff]  ;;  %s2140_s23 = sld [smem:[#allocation9_spill]] }
   0xe   :  { %1587 = vrcp.f32 %v1675_v4  ;;  %157 = vmatpush.bf16.msra.mxu0 %v1542_v21  ;;  %v1570_v47 = vld [vmem:[%s2116_s3] ss:$0 sm:$0xff]  ;;  %vm165_vm8 = vcmask 785408   ;;  %s1676_s3 = smov 112   ;;  %s1677_s28 = smov 96   ;;  %vm176_vm9 = vcmask 130048  }
   0xf   :  { %v1571_v52 = vld [vmem:[%s2118_s5] ss:$0 sm:$0xff]  ;;  %s1678_s29 = smov 80   ;;  %s2141_s19 = sld [smem:[#allocation8_spill]]  ;;  %vm199_vm10 = vcmask 64512   ;;  %vm217_vm11 = vcmask 1043456  }
  0x10   :  { %s1679_s21 = smov 64   ;;  %s1680_s22 = smov 48   ;;  %vm300_vm12 = vcmask 261248  }
  0x11   :  { %s2134_s2 = smov 16  }
  0x12   :  { %158 = vmatpush.bf16.msra.mxu0 %v1541_v23 }
  0x13   :  { %v1569_v42 = vld [vmem:[%s2140_s23] ss:$0 sm:$0xff] }
  0x14   :  { %70 = vadd.xlane.f32.xlu0 %v69_v3  ;;  %v1588_v5 = vpop.eup %1587 }
  0x15   :  { %v73_v6 = vmul.f32 32.0, %v1588_v5  ;;  %vm77_vm1 = vweird.f32 %v1588_v5 }
  0x17   :  { %v74_v7 = vsub.f32 1.0, %v73_v6 }
  0x19   :  { %v75_v8 = vmul.f32 %v1588_v5, %v74_v7  ;;  %v168_v7 = vld [vmem:[%s2141_s19] sm:$0x1] }
  0x1b   :  { %v76_v9 = vadd.f32 %v1588_v5, %v75_v8  ;;  %v169_v8 = vsub.f32 1.0, %v168_v7 }
  0x1d   :  { %v1786_v10 = vsel %vm77_vm1, %v1588_v5, %v76_v9  ;;  %v170_v9 = vmul.f32 -1e+09, %v169_v8 }
  0x7f   :  { %v68_v11 = vpop.xlane.xlu0 %67 }
  0x80   :  { %v79_v12 = vmul.f32 %v1786_v10, %v68_v11  ;;  %v197_v11 = vperm.slane %v170_v9, 0 }
  0x82   :  { %v81_v13 = vsub.f32 %v61_v0, %v79_v12 }
  0x84   :  { %v83_v14 = vmul.f32 %v81_v13, %v81_v13 }
  0x86   :  { %v85_v15 = vsel %vm65_vm0, %v83_v14, 0.0 }
  0x87   :  { %86 = vadd.xlane.f32.xlu1 %v85_v15  ;;  %v71_v16 = vpop.xlane.xlu0 %70 }
  0x88   :  { %v80_v17 = vmul.f32 %v1786_v10, %v71_v16 }
  0x8a   :  { %v82_v18 = vsub.f32 %v62_v2, %v80_v17  ;;  %v302_v17 = vld [vmem:[%s2141_s19 + $0x1] sm:$0x1] }
  0x8c   :  { %v84_v19 = vmul.f32 %v82_v18, %v82_v18 }
  0x8e   :  { %v88_v20 = vsel %vm65_vm0, %v84_v19, 0.0 }
  0x8f   :  { %89 = vadd.xlane.f32.xlu1 %v88_v20 }
  0xfa   :  { %v87_v22 = vpop.xlane.xlu1 %86 }
  0xfb   :  { %v91_v24 = vmul.f32 %v87_v22, %v1786_v10 }
  0xfd   :  { %v93_v25 = vadd.f32 1e-12, %v91_v24 }
  0xff   :  { %1589 = vrsqrt.f32 %v93_v25  ;;  %vm101_vm3 = vweird.f32 %v93_v25 }
 0x102   :  { %v90_v26 = vpop.xlane.xlu1 %89 }
 0x103   :  { %v92_v27 = vmul.f32 %v90_v26, %v1786_v10 }
 0x105   :  { %v1590_v28 = vpop.eup %1589  ;;  %v94_v29 = vadd.f32 1e-12, %v92_v27 }
 0x106   :  { %v96_v30 = vmul.f32 %v1590_v28, %v93_v25  ;;  %vm102_vm2 = vweird.f32 %v1590_v28 }
 0x107   :  { %1591 = vrsqrt.f32 %v94_v29  ;;  %vm103_vm4 = vmor %vm101_vm3, %vm102_vm2  ;;  %vm111_vm6 = vweird.f32 %v94_v29 }
 0x108   :  { %v97_v31 = vmul.f32 %v1590_v28, %v96_v30 }
 0x10a   :  { %v98_v32 = vmul.f32 0.5, %v97_v31 }
 0x10c   :  { %v99_v33 = vsub.f32 1.5, %v98_v32 }
 0x10d   :  { %v1592_v34 = vpop.eup %1591 }
 0x10e   :  { %v100_v35 = vmul.f32 %v1590_v28, %v99_v33  ;;  %v106_v36 = vmul.f32 %v1592_v34, %v94_v29  ;;  %vm112_vm5 = vweird.f32 %v1592_v34 }
 0x10f   :  { %vm113_vm7 = vmor %vm111_vm6, %vm112_vm5 }
 0x110   :  { %v107_v37 = vmul.f32 %v1592_v34, %v106_v36  ;;  %v104_v38 = vsel %vm103_vm4, %v1590_v28, %v100_v35  ;;  %vm623_vm4 = vcmask 523264  }
 0x111   :  { %v115_v41 = vmul.f32 %v104_v38, %v81_v13 }
 0x112   :  { %v108_v39 = vmul.f32 0.5, %v107_v37 }
 0x113   :  { %v120_v46 = vmul.f32 %v1569_v42, %v115_v41 }
 0x114   :  { %v109_v40 = vsub.f32 1.5, %v108_v39 }
 0x115   :  { %v1806_v49 = vadd.f32 %v1570_v47, %v120_v46 }
 0x116   :  { %v110_v43 = vmul.f32 %v1592_v34, %v109_v40 }
 0x118   :  { %v114_v44 = vsel %vm113_vm7, %v1592_v34, %v110_v43 }
 0x119   :  { %v116_v45 = vmul.f32 %v114_v44, %v82_v18  ;;  %v303_v18 = vsub.f32 1.0, %v302_v17 }
 0x11b   :  { %v121_v48 = vmul.f32 %v1569_v42, %v116_v45  ;;  %v304_v19 = vmul.f32 -1e+09, %v303_v18 }
 0x11d   :  { %v1808_v50 = vadd.f32 %v1570_v47, %v121_v48  ;;  %v330_v22 = vperm.slane %v304_v19, 0 }
 0x11f   :  { %v127_v51 = vpack.c.bf16 %v1808_v50, %v1806_v49 }
 0x121   :  { %1413 = vmatmul.msk.bf16.vlgmr.msra.gmra.mxu0 %vm65_vm0, %v127_v51 }
 0x19e   :  { %v160_v53 = vpop.f32.mrf.mxu0 }
 0x19f   :  { %v161_v54 = vadd.f32 %v1571_v52, %v160_v53 }
 0x1a1   :  { %166 = vst.msk [vmem:[#allocation2] sm:$0xff] %vm165_vm8, %v161_v54 }
 0x1a6   :  { %v162_v55 = vpop.f32.mrf.mxu0 }
 0x1a7   :  { %v163_v56 = vadd.f32 %v1571_v52, %v162_v55 }
 0x1a8   :  { %v235_v57 = vld [vmem:[#allocation2] sm:$0xff] }
 0x1a9   :  { %167 = vst.msk [vmem:[#allocation2 + $0x8] sm:$0xff] %vm165_vm8, %v163_v56  ;;  %v1818_v58 = vpack.c.bf16 %v235_v57, %v235_v57 }
 0x1ab   :  { %238 = vrot.lane.b32.xlu0 %v1818_v58, %s1676_s3  ;;  %174 = vrot.lane.b32.xlu2 %v1818_v58, %s1677_s28 }
 0x1b0   :  { %v366_v59 = vld [vmem:[#allocation2 + $0x8] sm:$0xff] }
 0x1b1   :  { %v367_v60 = vpack.c.bf16 %v366_v59, %v366_v59 }
 0x1b3   :  { %371 = vrot.lane.b32.xlu1 %v367_v60, %s1678_s29  ;;  %240 = vrot.lane.b32.xlu2 %v1818_v58, %s1678_s29 }
 0x1bb   :  { %369 = vrot.lane.b32.xlu2 %v367_v60, %s1676_s3 }
 0x1c3   :  { %308 = vrot.lane.b32.xlu2 %v367_v60, %s1677_s28 }
 0x205   :  { %v175_v61 = vpop.permute.xlu2 %174 }
 0x206   :  { %v181_v62 = vsel %vm176_vm9, %v175_v61, 0 }
 0x207   :  { %190 = vmatpush.bf16.xpose.msra.mxu1 %v181_v62 }
 0x20d   :  { %v241_v63 = vpop.permute.xlu2 %240 }
 0x20e   :  { %1414 = vmatmul.msk.bf16.vlgmr.msra.gmra.mxu1 %vm176_vm9, %v1818_v58  ;;  %v246_v0 = vsel %vm176_vm9, %v241_v63, 0 }
 0x20f   :  { %255 = vmatpush.bf16.xpose.msra.mxu3 %v246_v0 }
 0x215   :  { %v370_v1 = vpop.permute.xlu2 %369 }
 0x21d   :  { %v239_v2 = vpop.permute.xlu0 %238  ;;  %v309_v3 = vpop.permute.xlu2 %308 }
 0x21e   :  { %1416 = vmatmul.msk.bf16.vlgmr.msra.gmra.mxu3 %vm176_vm9, %v239_v2  ;;  %v314_v4 = vsel %vm176_vm9, %v309_v3, 0 }
 0x21f   :  { %323 = vmatpush.bf16.xpose.msrb.mxu0 %v314_v4 }
 0x225   :  { %v372_v5 = vpop.permute.xlu1 %371 }
 0x226   :  { %1418 = vmatmul.msk.bf16.vlgmr.msrb.gmra.mxu0 %vm176_vm9, %v367_v60  ;;  %v377_v6 = vsel %vm176_vm9, %v372_v5, 0 }
 0x227   :  { %386 = vmatpush.bf16.xpose.msrb.mxu3 %v377_v6 }
 0x22e   :  { %1420 = vmatmul.msk.bf16.vlgmr.msrb.gmra.mxu3 %vm176_vm9, %v370_v1 }
 0x28b   :  { %v192_v12 = vpop.f32.mrf.mxu1 }
 0x28c   :  { %v196_v13 = vmul.f32 0.25, %v192_v12 }
 0x28e   :  { %v198_v14 = vadd.f32 %v197_v11, %v196_v13 }
 0x290   :  { %v200_v15 = vsel %vm199_vm10, %v198_v14, -inf }
 0x291   :  { %201 = vmax.xlane.f32.xlu2 %v200_v15 }
 0x293   :  { %v194_v16 = vpop.f32.mrf.mxu1 }
 0x2a1   :  { %v257_v20 = vpop.f32.mrf.mxu3 }
 0x2a2   :  { %v261_v21 = vmul.f32 0.25, %v257_v20 }
 0x2a3   :  { %v325_v23 = vpop.f32.mrf.mxu0 }
 0x2a4   :  { %v329_v24 = vmul.f32 0.25, %v325_v23  ;;  %v262_v25 = vadd.f32 %v261_v21, %v197_v11 }
 0x2a6   :  { %v263_v26 = vsel %vm199_vm10, %v262_v25, -inf  ;;  %v1846_v27 = vadd.f32 %v330_v22, %v329_v24 }
 0x2a7   :  { %264 = vmax.xlane.f32.xlu0 %v263_v26  ;;  %v1543_v26 = vld [vmem:[%s2119_s6] sm:$0xff] }
 0x2a8   :  { %v332_v52 = vsel %vm199_vm10, %v1846_v27, -inf }
 0x2a9   :  { %v259_v28 = vpop.f32.mrf.mxu3 }
 0x2ab   :  { %v327_v29 = vpop.f32.mrf.mxu0 }
 0x2b1   :  { %v388_v30 = vpop.f32.mrf.mxu3 }
 0x2b2   :  { %v392_v31 = vmul.f32 0.25, %v388_v30 }
 0x2b4   :  { %v393_v32 = vadd.f32 %v392_v31, %v330_v22 }
 0x2b6   :  { %v394_v33 = vsel %vm199_vm10, %v393_v32, -inf }
 0x2b7   :  { %395 = vmax.xlane.f32.xlu1 %v394_v33 }
 0x2b9   :  { %v390_v34 = vpop.f32.mrf.mxu3 }
 0x2ba   :  { %v1572_v34 = vld [vmem:[%s2120_s7] ss:$0 sm:$0xff] }
 0x2bb   :  { %212 = vrot.lane.b32.xlu0 %v1818_v58, %s1679_s21 }
 0x2c3   :  { %406 = vrot.lane.b32.xlu0 %v367_v60, %s1680_s22 }
 0x2cb   :  { %344 = vrot.lane.b32.xlu0 %v367_v60, %s1679_s21 }
 0x2d0   :  { %275 = vrot.lane.b32.xlu1 %v1818_v58, %s1680_s22 }
 0x304   :  { %v202_v35 = vpop.xlane.xlu2 %201 }
 0x305   :  { %v203_v36 = vsub.f32 %v198_v14, %v202_v35 }
 0x307   :  { %v204_v37 = vmul.f32 1.442695, %v203_v36 }
 0x309   :  { %1593 = vpow2.f32 %v204_v37 }
 0x30f   :  { %v1594_v38 = vpop.eup %1593 }
 0x310   :  { %v206_v39 = vsel %vm199_vm10, %v1594_v38, 0.0 }
 0x311   :  { %207 = vadd.xlane.f32.xlu2 %v206_v39 }
 0x31a   :  { %v265_v40 = vpop.xlane.xlu0 %264 }
 0x31b   :  { %v266_v41 = vsub.f32 %v262_v25, %v265_v40  ;;  %v1544_v25 = vld [vmem:[%s2119_s6 + $0x8] sm:$0xff] }
 0x31c   :  { %464 = vmatpush.bf16.msra.mxu0 %v1544_v25  ;;  %v1575_v25 = vld [vmem:[%s2124_s11] ss:$0 sm:$0xff] }
 0x31d   :  { %v267_v42 = vmul.f32 1.442695, %v266_v41 }
 0x31f   :  { %1595 = vpow2.f32 %v267_v42 }
 0x320   :  { %465 = vmatpush.bf16.msra.mxu0 %v1543_v26 }
 0x325   :  { %v1596_v43 = vpop.eup %1595 }
 0x326   :  { %v269_v44 = vsel %vm199_vm10, %v1596_v43, 0.0 }
 0x327   :  { %270 = vadd.xlane.f32.xlu2 %v269_v44 }
 0x32a   :  { %v396_v45 = vpop.xlane.xlu1 %395 }
 0x32b   :  { %v397_v46 = vsub.f32 %v393_v32, %v396_v45 }
 0x32d   :  { %v398_v47 = vmul.f32 1.442695, %v397_v46  ;;  %v213_v48 = vpop.permute.xlu0 %212 }
 0x32e   :  { %v219_v51 = vsel %vm217_vm11, %v213_v48, 0 }
 0x32f   :  { %1597 = vpow2.f32 %v398_v47  ;;  %228 = vmatpush.bf16.msra.mxu2 %v219_v51  ;;  %333 = vmax.xlane.f32.xlu2 %v332_v52 }
 0x335   :  { %v1598_v53 = vpop.eup %1597  ;;  %v407_v54 = vpop.permute.xlu0 %406 }
 0x336   :  { %v400_v55 = vsel %vm199_vm10, %v1598_v53, 0.0  ;;  %v412_v0 = vsel %vm217_vm11, %v407_v54, 0 }
 0x337   :  { %401 = vadd.xlane.f32.xlu2 %v400_v55 }
 0x33d   :  { %v345_v56 = vpop.permute.xlu0 %344 }
 0x33e   :  { %v350_v57 = vsel %vm217_vm11, %v345_v56, 0 }
 0x33f   :  { %359 = vmatpush.bf16.msrb.mxu1 %v350_v57  ;;  %v1545_v57 = vld [vmem:[%s2123_s10] sm:$0xff] }
 0x342   :  { %v276_v58 = vpop.permute.xlu1 %275 }
 0x343   :  { %v281_v59 = vsel %vm217_vm11, %v276_v58, 0 }
 0x344   :  { %290 = vmatpush.bf16.msrb.mxu2 %v281_v59 }
 0x384   :  { %v208_v60 = vpop.xlane.xlu2 %207 }
 0x385   :  { %1599 = vrcp.f32 %v208_v60 }
 0x38b   :  { %v1600_v61 = vpop.eup %1599 }
 0x38c   :  { %v210_v62 = vmul.f32 %v1600_v61, %v1594_v38 }
 0x38e   :  { %v211_v63 = vpack.c.bf16 %v210_v62, %v210_v62 }
 0x390   :  { %1415 = vmatmul.msk.bf16.vlgmr.msra.gmra.mxu2 %vm199_vm10, %v211_v63 }
 0x391   :  { %421 = vmatpush.bf16.msra.mxu2 %v412_v0 }
 0x39a   :  { %v271_v1 = vpop.xlane.xlu2 %270 }
 0x39b   :  { %1601 = vrcp.f32 %v271_v1 }
 0x3a1   :  { %v1602_v2 = vpop.eup %1601 }
 0x3a2   :  { %v273_v3 = vmul.f32 %v1602_v2, %v1596_v43  ;;  %v334_v4 = vpop.xlane.xlu2 %333 }
 0x3a3   :  { %v335_v5 = vsub.f32 %v1846_v27, %v334_v4 }
 0x3a4   :  { %v274_v6 = vpack.c.bf16 %v273_v3, %v273_v3 }
 0x3a5   :  { %v336_v7 = vmul.f32 1.442695, %v335_v5 }
 0x3a6   :  { %1417 = vmatmul.msk.bf16.vlgmr.msrb.gmra.mxu2 %vm199_vm10, %v274_v6 }
 0x3a7   :  { %1603 = vpow2.f32 %v336_v7 }
 0x3aa   :  { %v402_v8 = vpop.xlane.xlu2 %401 }
 0x3ab   :  { %1605 = vrcp.f32 %v402_v8 }
 0x3ad   :  { %v1604_v9 = vpop.eup %1603 }
 0x3ae   :  { %v338_v11 = vsel %vm199_vm10, %v1604_v9, 0.0 }
 0x3af   :  { %339 = vadd.xlane.f32.xlu2 %v338_v11 }
 0x3b1   :  { %v1606_v12 = vpop.eup %1605 }
 0x3b2   :  { %v404_v13 = vmul.f32 %v1606_v12, %v1598_v53 }
 0x3b4   :  { %v405_v14 = vpack.c.bf16 %v404_v13, %v404_v13 }
 0x3b6   :  { %1421 = vmatmul.msk.bf16.vlgmr.msra.gmra.mxu2 %vm199_vm10, %v405_v14  ;;  %v1574_v14 = vld [vmem:[%s2122_s9] ss:$0 sm:$0xff] }
 0x413   :  { %v230_v15 = vpop.f32.mrf.mxu2 }
 0x414   :  { %234 = vst.msk [vmem:[#allocation3] sm:$0xff] %vm176_vm9, %v230_v15 }
 0x41b   :  { %v232_v16 = vpop.f32.mrf.mxu2 }
 0x422   :  { %v340_v17 = vpop.xlane.xlu2 %339 }
 0x423   :  { %1607 = vrcp.f32 %v340_v17 }
 0x429   :  { %v1608_v18 = vpop.eup %1607  ;;  %v292_v19 = vpop.f32.mrf.mxu2 }
 0x42a   :  { %v342_v20 = vmul.f32 %v1608_v18, %v1604_v9  ;;  %297 = vrot.lane.b32.xlu1 %v292_v19, %s2134_s2  ;;  %v1573_v9 = vld [vmem:[%s2121_s8] ss:$0 sm:$0xff] }
 0x42c   :  { %v343_v21 = vpack.c.bf16 %v342_v20, %v342_v20 }
 0x42e   :  { %1419 = vmatmul.msk.bf16.vlgmr.msrb.gmra.mxu1 %vm199_vm10, %v343_v21  ;;  %v1550_v21 = vld [vmem:[%s2125_s12 + $0x18] sm:$0xff] }
 0x42f   :  { %631 = vmatpush.bf16.msra.mxu3 %v1550_v21 }
 0x431   :  { %v294_v22 = vpop.f32.mrf.mxu2 }
 0x432   :  { %v1549_v22 = vld [vmem:[%s2125_s12 + $0x10] sm:$0xff] }
 0x433   :  { %632 = vmatpush.bf16.msra.mxu3 %v1549_v22 }
 0x439   :  { %v423_v23 = vpop.f32.mrf.mxu2 }
 0x43a   :  { %428 = vrot.lane.b32.xlu2 %v423_v23, %s2134_s2  ;;  %v1548_v23 = vld [vmem:[%s2125_s12 + $0x8] sm:$0xff] }
 0x43b   :  { %633 = vmatpush.bf16.msra.mxu3 %v1548_v23 }
 0x441   :  { %v425_v24 = vpop.f32.mrf.mxu2 }
 0x442   :  { %v1547_v24 = vld [vmem:[%s2125_s12] sm:$0xff] }
 0x443   :  { %634 = vmatpush.bf16.msra.mxu3 %v1547_v24 }
 0x494   :  { %v429_v29 = vpop.permute.xlu2 %428 }
 0x49c   :  { %v298_v27 = vpop.permute.xlu1 %297 }
 0x49d   :  { %301 = vst.msk [vmem:[#allocation3] sm:$0xff] %vm300_vm12, %v298_v27 }
 0x4a4   :  { %v432_v31 = vld [vmem:[#allocation3] sm:$0xff] }
 0x4ab   :  { %v361_v28 = vpop.f32.mrf.mxu1 }
 0x4ac   :  { %365 = vst.msk [vmem:[#allocation3 + $0x8] sm:$0xff] %vm176_vm9, %v361_v28 }
 0x4ad   :  { %431 = vst.msk [vmem:[#allocation3 + $0x8] sm:$0xff] %vm300_vm12, %v429_v29 }
 0x4b3   :  { %v363_v30 = vpop.f32.mrf.mxu1 }
 0x4b4   :  { %v433_v32 = vld [vmem:[#allocation3 + $0x8] sm:$0xff] }
 0x4b5   :  { %v434_v33 = vpack.c.bf16 %v433_v32, %v432_v31 }
 0x4b7   :  { %1430 = vmatmul.msk.bf16.vlgmr.msra.gmra.mxu0 %vm65_vm0, %v434_v33 }
 0x534   :  { %v467_v35 = vpop.f32.mrf.mxu0 }
 0x535   :  { %v468_v36 = vadd.f32 %v1572_v34, %v467_v35 }
 0x537   :  { %v472_v37 = vadd.f32 %v468_v36, %v1806_v49 }
 0x539   :  { %v476_v38 = vsel %vm65_vm0, %v472_v37, 0.0 }
 0x53a   :  { %477 = vadd.xlane.f32.xlu0 %v476_v38 }
 0x53c   :  { %v469_v39 = vpop.f32.mrf.mxu0 }
 0x53d   :  { %v470_v40 = vadd.f32 %v1572_v34, %v469_v39 }
 0x53f   :  { %v473_v41 = vadd.f32 %v470_v40, %v1808_v50  ;;  %v1546_v50 = vld [vmem:[%s2123_s10 + $0x8] sm:$0xff] }
 0x540   :  { %560 = vmatpush.bf16.msra.mxu1 %v1546_v50 }
 0x541   :  { %v479_v42 = vsel %vm65_vm0, %v473_v41, 0.0 }
 0x542   :  { %480 = vadd.xlane.f32.xlu1 %v479_v42 }
 0x544   :  { %561 = vmatpush.bf16.msra.mxu1 %v1545_v57 }
 0x5ad   :  { %v478_v43 = vpop.xlane.xlu0 %477 }
 0x5ae   :  { %v482_v44 = vmul.f32 %v478_v43, %v1786_v10 }
 0x5b0   :  { %v484_v45 = vsub.f32 %v472_v37, %v482_v44 }
 0x5b2   :  { %v486_v46 = vmul.f32 %v484_v45, %v484_v45 }
 0x5b4   :  { %v488_v47 = vsel %vm65_vm0, %v486_v46, 0.0 }
 0x5b5   :  { %v481_v48 = vpop.xlane.xlu1 %480  ;;  %489 = vadd.xlane.f32.xlu2 %v488_v47 }
 0x5b6   :  { %v483_v49 = vmul.f32 %v481_v48, %v1786_v10 }
 0x5b8   :  { %v485_v51 = vsub.f32 %v473_v41, %v483_v49  ;;  %v1576_v49 = vld [vmem:[%s2126_s13] ss:$0 sm:$0xff] }
 0x5ba   :  { %v487_v52 = vmul.f32 %v485_v51, %v485_v51 }
 0x5bc   :  { %v491_v53 = vsel %vm65_vm0, %v487_v52, 0.0 }
 0x5bd   :  { %492 = vadd.xlane.f32.xlu0 %v491_v53 }
 0x628   :  { %v490_v54 = vpop.xlane.xlu2 %489 }
 0x629   :  { %v494_v55 = vmul.f32 %v490_v54, %v1786_v10 }
 0x62b   :  { %v496_v56 = vadd.f32 1e-12, %v494_v55 }
 0x62d   :  { %1609 = vrsqrt.f32 %v496_v56  ;;  %vm504_vm14 = vweird.f32 %v496_v56 }
 0x630   :  { %v493_v58 = vpop.xlane.xlu0 %492 }
 0x631   :  { %v495_v59 = vmul.f32 %v493_v58, %v1786_v10 }
 0x633   :  { %v1610_v60 = vpop.eup %1609  ;;  %v497_v61 = vadd.f32 1e-12, %v495_v59 }
 0x634   :  { %v499_v62 = vmul.f32 %v1610_v60, %v496_v56  ;;  %vm505_vm13 = vweird.f32 %v1610_v60 }
 0x635   :  { %1611 = vrsqrt.f32 %v497_v61  ;;  %vm506_vm15 = vmor %vm504_vm14, %vm505_vm13  ;;  %vm514_vm2 = vweird.f32 %v497_v61 }
 0x636   :  { %v500_v63 = vmul.f32 %v1610_v60, %v499_v62 }
 0x638   :  { %v501_v0 = vmul.f32 0.5, %v500_v63 }
 0x63a   :  { %v502_v1 = vsub.f32 1.5, %v501_v0 }
 0x63b   :  { %v1612_v2 = vpop.eup %1611 }
 0x63c   :  { %v503_v3 = vmul.f32 %v1610_v60, %v502_v1  ;;  %v509_v4 = vmul.f32 %v1612_v2, %v497_v61  ;;  %vm515_vm1 = vweird.f32 %v1612_v2 }
 0x63d   :  { %vm516_vm3 = vmor %vm514_vm2, %vm515_vm1 }
 0x63e   :  { %v510_v5 = vmul.f32 %v1612_v2, %v509_v4  ;;  %v507_v6 = vsel %vm506_vm15, %v1610_v60, %v503_v3  ;;  %v1552_v4 = vld [vmem:[%s2117_s4 + $0x18] sm:$0xff] }
 0x63f   :  { %v518_v11 = vmul.f32 %v507_v6, %v484_v45  ;;  %731 = vmatpush.bf16.msrb.mxu2 %v1552_v4 }
 0x640   :  { %v511_v7 = vmul.f32 0.5, %v510_v5 }
 0x641   :  { %v523_v15 = vmul.f32 %v1573_v9, %v518_v11 }
 0x642   :  { %v512_v8 = vsub.f32 1.5, %v511_v7 }
 0x643   :  { %v528_v18 = vadd.f32 %v1574_v14, %v523_v15 }
 0x644   :  { %v513_v12 = vmul.f32 %v1612_v2, %v512_v8  ;;  %v1551_v8 = vld [vmem:[%s2117_s4 + $0x10] sm:$0xff] }
 0x645   :  { %732 = vmatpush.bf16.msrb.mxu2 %v1551_v8 }
 0x646   :  { %v517_v13 = vsel %vm516_vm3, %v1612_v2, %v513_v12 }
 0x647   :  { %v519_v16 = vmul.f32 %v517_v13, %v485_v51 }
 0x649   :  { %v524_v17 = vmul.f32 %v1573_v9, %v519_v16 }
 0x64b   :  { %v529_v19 = vadd.f32 %v1574_v14, %v524_v17 }
 0x64d   :  { %v530_v20 = vpack.c.bf16 %v529_v19, %v528_v18 }
 0x64f   :  { %1439 = vmatmul.msk.bf16.vlgmr.msra.gmra.mxu1 %vm65_vm0, %v530_v20 }
 0x6cc   :  { %v563_v26 = vpop.f32.mrf.mxu1 }
 0x6cd   :  { %v564_v27 = vadd.f32 %v1575_v25, %v563_v26 }
 0x6cf   :  { %v570_v28 = vmul.f32 0.044715, %v564_v27  ;;  %v568_v43 = vmul.f32 0.5, %v564_v27 }
 0x6d1   :  { %v572_v29 = vmul.f32 %v570_v28, %v564_v27 }
 0x6d3   :  { %v574_v30 = vmul.f32 %v572_v29, %v564_v27  ;;  %v1578_v29 = vld [vmem:[%s2128_s15] ss:$0 sm:$0xff] }
 0x6d4   :  { %v565_v31 = vpop.f32.mrf.mxu1 }
 0x6d5   :  { %v576_v32 = vadd.f32 %v574_v30, %v564_v27  ;;  %v566_v33 = vadd.f32 %v1575_v25, %v565_v31  ;;  %v1577_v25 = vld [vmem:[%s2127_s14] ss:$0 sm:$0xff] }
 0x6d7   :  { %v571_v34 = vmul.f32 0.044715, %v566_v33  ;;  %v578_v35 = vmul.f32 0.7978846, %v576_v32  ;;  %v569_v44 = vmul.f32 0.5, %v566_v33 }
 0x6d9   :  { %v573_v36 = vmul.f32 %v571_v34, %v566_v33  ;;  %1613 = vtanh.f32 %v578_v35 }
 0x6db   :  { %v575_v37 = vmul.f32 %v573_v36, %v566_v33  ;;  %v1579_v36 = vld [vmem:[%s2118_s5 + $0x1] ss:$0 sm:$0xff] }
 0x6dd   :  { %v577_v38 = vadd.f32 %v575_v37, %v566_v33 }
 0x6df   :  { %v579_v39 = vmul.f32 0.7978846, %v577_v38  ;;  %v1614_v40 = vpop.eup %1613 }
 0x6e0   :  { %v582_v41 = vadd.f32 1.0, %v1614_v40 }
 0x6e1   :  { %1615 = vtanh.f32 %v579_v39 }
 0x6e2   :  { %v584_v46 = vmul.f32 %v582_v41, %v568_v43 }
 0x6e7   :  { %v1616_v42 = vpop.eup %1615 }
 0x6e8   :  { %v583_v45 = vadd.f32 1.0, %v1616_v42 }
 0x6ea   :  { %v585_v47 = vmul.f32 %v583_v45, %v569_v44 }
 0x6ec   :  { %v586_v48 = vpack.c.bf16 %v585_v47, %v584_v46 }
 0x6ee   :  { %1456 = vmatmul.msk.bf16.vlgmr.msra.gmra.mxu3 %vm623_vm4, %v586_v48 }
 0x771   :  { %v636_v51 = vpop.f32.mrf.mxu3 }
 0x772   :  { %v637_v52 = vadd.f32 %v1576_v49, %v636_v51 }
 0x774   :  { %v641_v53 = vadd.f32 %v637_v52, %v528_v18 }
 0x776   :  { %v645_v50 = vsel %vm65_vm0, %v641_v53, 0.0 }
 0x777   :  { %646 = vadd.xlane.f32.xlu1 %v645_v50 }
 0x779   :  { %v638_v54 = vpop.f32.mrf.mxu3 }
 0x77a   :  { %v639_v55 = vadd.f32 %v1576_v49, %v638_v54 }
 0x77c   :  { %v642_v56 = vadd.f32 %v639_v55, %v529_v19  ;;  %v741_v55 = vld [vmem:[%s2141_s19] sm:$0x1] }
 0x77e   :  { %v648_v57 = vsel %vm65_vm0, %v642_v56, 0.0 }
 0x77f   :  { %649 = vadd.xlane.f32.xlu0 %v648_v57 }
 0x7ea   :  { %v647_v58 = vpop.xlane.xlu1 %646 }
 0x7eb   :  { %v651_v59 = vmul.f32 %v647_v58, %v1786_v10 }
 0x7ed   :  { %v653_v60 = vsub.f32 %v641_v53, %v651_v59 }
 0x7ef   :  { %v655_v61 = vmul.f32 %v653_v60, %v653_v60 }
 0x7f1   :  { %v657_v62 = vsel %vm65_vm0, %v655_v61, 0.0 }
 0x7f2   :  { %v650_v63 = vpop.xlane.xlu0 %649  ;;  %658 = vadd.xlane.f32.xlu1 %v657_v62  ;;  %v871_v62 = vld [vmem:[%s2141_s19 + $0x1] sm:$0x1]  ;;  %s2142_s19 = smov 16  }
 0x7f3   :  { %v652_v0 = vmul.f32 %v650_v63, %v1786_v10 }
 0x7f5   :  { %v654_v1 = vsub.f32 %v642_v56, %v652_v0  ;;  %v742_v56 = vsub.f32 1.0, %v741_v55  ;;  %v872_v0 = vsub.f32 1.0, %v871_v62 }
 0x7f7   :  { %v656_v2 = vmul.f32 %v654_v1, %v654_v1  ;;  %v743_v57 = vmul.f32 -1e+09, %v742_v56  ;;  %v873_v4 = vmul.f32 -1e+09, %v872_v0 }
 0x7f9   :  { %v660_v3 = vsel %vm65_vm0, %v656_v2, 0.0  ;;  %v769_v58 = vperm.slane %v743_v57, 0 }
 0x7fa   :  { %661 = vadd.xlane.f32.xlu0 %v660_v3 }
 0x865   :  { %v659_v5 = vpop.xlane.xlu1 %658 }
 0x866   :  { %v663_v6 = vmul.f32 %v659_v5, %v1786_v10 }
 0x868   :  { %v665_v7 = vadd.f32 1e-12, %v663_v6 }
 0x86a   :  { %1617 = vrsqrt.f32 %v665_v7  ;;  %vm673_vm6 = vweird.f32 %v665_v7 }
 0x86d   :  { %v662_v9 = vpop.xlane.xlu0 %661 }
 0x86e   :  { %v664_v11 = vmul.f32 %v662_v9, %v1786_v10 }
 0x870   :  { %v1618_v12 = vpop.eup %1617  ;;  %v666_v13 = vadd.f32 1e-12, %v664_v11 }
 0x871   :  { %v668_v14 = vmul.f32 %v1618_v12, %v665_v7  ;;  %vm674_vm5 = vweird.f32 %v1618_v12  ;;  %v899_v7 = vperm.slane %v873_v4, 0 }
 0x872   :  { %1619 = vrsqrt.f32 %v666_v13  ;;  %vm675_vm7 = vmor %vm673_vm6, %vm674_vm5  ;;  %vm683_vm14 = vweird.f32 %v666_v13 }
 0x873   :  { %v669_v15 = vmul.f32 %v1618_v12, %v668_v14 }
 0x875   :  { %v670_v16 = vmul.f32 0.5, %v669_v15 }
 0x877   :  { %v671_v17 = vsub.f32 1.5, %v670_v16 }
 0x878   :  { %v1620_v18 = vpop.eup %1619 }
 0x879   :  { %v672_v19 = vmul.f32 %v1618_v12, %v671_v17  ;;  %v678_v20 = vmul.f32 %v1620_v18, %v666_v13  ;;  %vm684_vm13 = vweird.f32 %v1620_v18 }
 0x87a   :  { %vm685_vm15 = vmor %vm683_vm14, %vm684_vm13  ;;  %vm1337_vm13 = vcmask 16384  }
 0x87b   :  { %v679_v21 = vmul.f32 %v1620_v18, %v678_v20  ;;  %v676_v22 = vsel %vm675_vm7, %v1618_v12, %v672_v19 }
 0x87c   :  { %v687_v26 = vmul.f32 %v676_v22, %v653_v60 }
 0x87d   :  { %v680_v23 = vmul.f32 0.5, %v679_v21 }
 0x87e   :  { %v692_v30 = vmul.f32 %v1577_v25, %v687_v26 }
 0x87f   :  { %v681_v24 = vsub.f32 1.5, %v680_v23 }
 0x880   :  { %v1948_v33 = vadd.f32 %v1578_v29, %v692_v30 }
 0x881   :  { %v682_v27 = vmul.f32 %v1620_v18, %v681_v24 }
 0x883   :  { %v686_v28 = vsel %vm685_vm15, %v1620_v18, %v682_v27 }
 0x884   :  { %v688_v31 = vmul.f32 %v686_v28, %v654_v1 }
 0x886   :  { %v693_v32 = vmul.f32 %v1577_v25, %v688_v31 }
 0x888   :  { %v1950_v34 = vadd.f32 %v1578_v29, %v693_v32 }
 0x88a   :  { %v699_v35 = vpack.c.bf16 %v1950_v34, %v1948_v33 }
 0x88c   :  { %1470 = vmatmul.msk.bf16.vlgmr.msrb.gmra.mxu2 %vm65_vm0, %v699_v35 }
 0x90f   :  { %v734_v37 = vpop.f32.mrf.mxu2 }
 0x910   :  { %v735_v38 = vadd.f32 %v1579_v36, %v734_v37 }
 0x912   :  { %739 = vst.msk [vmem:[#allocation2] sm:$0xff] %vm165_vm8, %v735_v38 }
 0x917   :  { %v736_v39 = vpop.f32.mrf.mxu2 }
 0x918   :  { %v737_v40 = vadd.f32 %v1579_v36, %v736_v39 }
 0x919   :  { %v805_v41 = vld [vmem:[#allocation2] sm:$0xff] }
 0x91a   :  { %740 = vst.msk [vmem:[#allocation2 + $0x8] sm:$0xff] %vm165_vm8, %v737_v40  ;;  %v806_v42 = vpack.c.bf16 %v805_v41, %v805_v41 }
 0x91c   :  { %808 = vrot.lane.b32.xlu2 %v806_v42, %s1676_s3  ;;  %810 = vrot.lane.b32.xlu1 %v806_v42, %s1678_s29 }
 0x921   :  { %v935_v43 = vld [vmem:[#allocation2 + $0x8] sm:$0xff] }
 0x922   :  { %v936_v44 = vpack.c.bf16 %v935_v43, %v935_v43 }
 0x924   :  { %940 = vrot.lane.b32.xlu0 %v936_v44, %s1678_s29  ;;  %877 = vrot.lane.b32.xlu2 %v936_v44, %s1677_s28 }
 0x925   :  { %938 = vrot.lane.b32.xlu1 %v936_v44, %s1676_s3 }
 0x92c   :  { %747 = vrot.lane.b32.xlu0 %v806_v42, %s1677_s28 }
 0x976   :  { %v809_v47 = vpop.permute.xlu2 %808 }
 0x97e   :  { %v878_v51 = vpop.permute.xlu2 %877 }
 0x97f   :  { %v883_v50 = vsel %vm176_vm9, %v878_v51, 0 }
 0x98e   :  { %v811_v45 = vpop.permute.xlu1 %810 }
 0x98f   :  { %v816_v46 = vsel %vm176_vm9, %v811_v45, 0 }
 0x990   :  { %825 = vmatpush.bf16.xpose.msrb.mxu3 %v816_v46 }
 0x996   :  { %v941_v48 = vpop.permute.xlu0 %940 }
 0x997   :  { %v946_v49 = vsel %vm176_vm9, %v941_v48, 0  ;;  %1473 = vmatmul.msk.bf16.vlgmr.msrb.gmra.mxu3 %vm176_vm9, %v809_v47  ;;  %v939_v54 = vpop.permute.xlu1 %938 }
 0x998   :  { %955 = vmatpush.bf16.xpose.msra.mxu3 %v946_v49 }
 0x99e   :  { %v748_v52 = vpop.permute.xlu0 %747 }
 0x99f   :  { %v753_v53 = vsel %vm176_vm9, %v748_v52, 0 }
 0x9a0   :  { %762 = vmatpush.bf16.xpose.msrb.mxu0 %v753_v53 }
 0x9a7   :  { %1471 = vmatmul.msk.bf16.vlgmr.msrb.gmra.mxu0 %vm176_vm9, %v806_v42  ;;  %1477 = vmatmul.msk.bf16.vlgmr.msra.gmra.mxu3 %vm176_vm9, %v939_v54 }
 0x9a8   :  { %892 = vmatpush.bf16.xpose.msra.mxu0 %v883_v50 }
 0x9b7   :  { %1475 = vmatmul.msk.bf16.vlgmr.msra.gmra.mxu0 %vm176_vm9, %v936_v44 }
 0xa1a   :  { %v827_v59 = vpop.f32.mrf.mxu3 }
 0xa1b   :  { %v831_v60 = vmul.f32 0.25, %v827_v59 }
 0xa1d   :  { %v832_v61 = vadd.f32 %v831_v60, %v769_v58 }
 0xa1f   :  { %v833_v63 = vsel %vm199_vm10, %v832_v61, -inf }
 0xa20   :  { %834 = vmax.xlane.f32.xlu1 %v833_v63 }
 0xa22   :  { %v829_v1 = vpop.f32.mrf.mxu3 }
 0xa24   :  { %v764_v2 = vpop.f32.mrf.mxu0 }
 0xa25   :  { %v768_v3 = vmul.f32 0.25, %v764_v2 }
 0xa27   :  { %v770_v5 = vadd.f32 %v769_v58, %v768_v3 }
 0xa29   :  { %v771_v6 = vsel %vm199_vm10, %v770_v5, -inf }
 0xa2a   :  { %v957_v8 = vpop.f32.mrf.mxu3  ;;  %772 = vmax.xlane.f32.xlu2 %v771_v6 }
 0xa2b   :  { %v961_v9 = vmul.f32 0.25, %v957_v8 }
 0xa2c   :  { %v766_v11 = vpop.f32.mrf.mxu0 }
 0xa2d   :  { %v962_v12 = vadd.f32 %v961_v9, %v899_v7  ;;  %v1554_v11 = vld [vmem:[%s2119_s6 + $0x18] sm:$0xff] }
 0xa2e   :  { %1035 = vmatpush.bf16.msrb.mxu0 %v1554_v11 }
 0xa2f   :  { %v963_v13 = vsel %vm199_vm10, %v962_v12, -inf }
 0xa30   :  { %964 = vmax.xlane.f32.xlu0 %v963_v13 }
 0xa32   :  { %v959_v14 = vpop.f32.mrf.mxu3 }
 0xa34   :  { %v894_v15 = vpop.f32.mrf.mxu0 }
 0xa35   :  { %v898_v16 = vmul.f32 0.25, %v894_v15 }
 0xa37   :  { %v900_v17 = vadd.f32 %v899_v7, %v898_v16 }
 0xa39   :  { %v901_v18 = vsel %vm199_vm10, %v900_v17, -inf }
 0xa3a   :  { %902 = vmax.xlane.f32.xlu2 %v901_v18  ;;  %v1580_v18 = vld [vmem:[%s2120_s7 + $0x1] ss:$0 sm:$0xff] }
 0xa3c   :  { %v896_v19 = vpop.f32.mrf.mxu0 }
 0xa44   :  { %845 = vrot.lane.b32.xlu0 %v806_v42, %s1680_s22 }
 0xa4c   :  { %783 = vrot.lane.b32.xlu0 %v806_v42, %s1679_s21 }
 0xa52   :  { %975 = vrot.lane.b32.xlu2 %v936_v44, %s1680_s22 }
 0xa54   :  { %913 = vrot.lane.b32.xlu0 %v936_v44, %s1679_s21  ;;  %s1396_s21 = sshll.u32 %s2131_s18, 4  ;;  %s1397_s21 = int_to_ptr.hbm [resolvable:$true] %s1396_s21 }
 0xa93   :  { %v835_v20 = vpop.xlane.xlu1 %834 }
 0xa94   :  { %v836_v21 = vsub.f32 %v832_v61, %v835_v20 }
 0xa96   :  { %v837_v22 = vmul.f32 1.442695, %v836_v21 }
 0xa98   :  { %1621 = vpow2.f32 %v837_v22 }
 0xa9d   :  { %v773_v25 = vpop.xlane.xlu2 %772 }
 0xa9e   :  { %v1622_v23 = vpop.eup %1621  ;;  %v774_v28 = vsub.f32 %v770_v5, %v773_v25 }
 0xa9f   :  { %v839_v24 = vsel %vm199_vm10, %v1622_v23, 0.0 }
 0xaa0   :  { %840 = vadd.xlane.f32.xlu1 %v839_v24  ;;  %v775_v30 = vmul.f32 1.442695, %v774_v28 }
 0xaa3   :  { %v965_v26 = vpop.xlane.xlu0 %964 }
 0xaa4   :  { %v966_v27 = vsub.f32 %v962_v12, %v965_v26  ;;  %v1553_v12 = vld [vmem:[%s2119_s6 + $0x10] sm:$0xff] }
 0xaa5   :  { %1036 = vmatpush.bf16.msrb.mxu0 %v1553_v12 }
 0xaa6   :  { %v967_v29 = vmul.f32 1.442695, %v966_v27 }
 0xaa8   :  { %1623 = vpow2.f32 %v967_v29 }
 0xaa9   :  { %1625 = vpow2.f32 %v775_v30 }
 0xaad   :  { %v903_v31 = vpop.xlane.xlu2 %902 }
 0xaae   :  { %v1624_v32 = vpop.eup %1623  ;;  %v904_v35 = vsub.f32 %v900_v17, %v903_v31 }
 0xaaf   :  { %v969_v36 = vsel %vm199_vm10, %v1624_v32, 0.0  ;;  %v1626_v38 = vpop.eup %1625 }
 0xab0   :  { %970 = vadd.xlane.f32.xlu1 %v969_v36  ;;  %v905_v37 = vmul.f32 1.442695, %v904_v35  ;;  %v777_v42 = vsel %vm199_vm10, %v1626_v38, 0.0 }
 0xab2   :  { %1627 = vpow2.f32 %v905_v37 }
 0xab5   :  { %v976_v39 = vpop.permute.xlu2 %975 }
 0xab6   :  { %v846_v40 = vpop.permute.xlu0 %845  ;;  %v981_v43 = vsel %vm217_vm11, %v976_v39, 0 }
 0xab7   :  { %v851_v41 = vsel %vm217_vm11, %v846_v40, 0 }
 0xab8   :  { %778 = vadd.xlane.f32.xlu1 %v777_v42  ;;  %860 = vmatpush.bf16.msra.mxu2 %v851_v41  ;;  %v1628_v44 = vpop.eup %1627  ;;  %v1555_v41 = vld [vmem:[%s2123_s10 + $0x10] sm:$0xff] }
 0xab9   :  { %v907_v47 = vsel %vm199_vm10, %v1628_v44, 0.0 }
 0xabc   :  { %990 = vmatpush.bf16.msrb.mxu2 %v981_v43 }
 0xabe   :  { %v784_v45 = vpop.permute.xlu0 %783 }
 0xabf   :  { %v789_v46 = vsel %vm217_vm11, %v784_v45, 0 }
 0xac0   :  { %908 = vadd.xlane.f32.xlu1 %v907_v47  ;;  %798 = vmatpush.bf16.msrb.mxu1 %v789_v46 }
 0xac6   :  { %v914_v48 = vpop.permute.xlu0 %913 }
 0xac7   :  { %v919_v49 = vsel %vm217_vm11, %v914_v48, 0 }
 0xac8   :  { %928 = vmatpush.bf16.msra.mxu1 %v919_v49 }
 0xb13   :  { %v841_v51 = vpop.xlane.xlu1 %840 }
 0xb14   :  { %1629 = vrcp.f32 %v841_v51 }
 0xb1a   :  { %v1630_v52 = vpop.eup %1629 }
 0xb1b   :  { %v843_v53 = vmul.f32 %v1630_v52, %v1622_v23 }
 0xb1d   :  { %v844_v50 = vpack.c.bf16 %v843_v53, %v843_v53 }
 0xb1f   :  { %1474 = vmatmul.msk.bf16.vlgmr.msra.gmra.mxu2 %vm199_vm10, %v844_v50 }
 0xb23   :  { %v971_v54 = vpop.xlane.xlu1 %970 }
 0xb24   :  { %1631 = vrcp.f32 %v971_v54 }
 0xb2a   :  { %v1632_v55 = vpop.eup %1631 }
 0xb2b   :  { %v973_v56 = vmul.f32 %v1632_v55, %v1624_v32  ;;  %v779_v57 = vpop.xlane.xlu1 %778 }
 0xb2c   :  { %1633 = vrcp.f32 %v779_v57  ;;  %v1581_v57 = vld [vmem:[%s2121_s8 + $0x1] ss:$0 sm:$0xff] }
 0xb2d   :  { %v974_v58 = vpack.c.bf16 %v973_v56, %v973_v56 }
 0xb2f   :  { %1478 = vmatmul.msk.bf16.vlgmr.msrb.gmra.mxu2 %vm199_vm10, %v974_v58 }
 0xb32   :  { %v1634_v59 = vpop.eup %1633 }
 0xb33   :  { %v781_v60 = vmul.f32 %v1634_v59, %v1626_v38  ;;  %v909_v62 = vpop.xlane.xlu1 %908 }
 0xb34   :  { %1635 = vrcp.f32 %v909_v62 }
 0xb35   :  { %v782_v61 = vpack.c.bf16 %v781_v60, %v781_v60 }
 0xb37   :  { %1472 = vmatmul.msk.bf16.vlgmr.msrb.gmra.mxu1 %vm199_vm10, %v782_v61  ;;  %v1582_v61 = vld [vmem:[%s2122_s9 + $0x1] ss:$0 sm:$0xff]  ;;  %s1682_s9 = smov [#allocation4]  }
 0xb38   :  { %s1394_s28 = sshll.u32 %s1682_s9, 4  ;;  %s1395_s28 = int_to_ptr.vmem [resolvable:$true] %s1394_s28 }
 0xb3a   :  { %v1636_v63 = vpop.eup %1635 }
 0xb3b   :  { %v911_v0 = vmul.f32 %v1636_v63, %v1628_v44 }
 0xb3d   :  { %v912_v1 = vpack.c.bf16 %v911_v0, %v911_v0 }
 0xb47   :  { %1476 = vmatmul.msk.bf16.vlgmr.msra.gmra.mxu1 %vm199_vm10, %v912_v1 }
 0xba2   :  { %v862_v2 = vpop.f32.mrf.mxu2 }
 0xba3   :  { %867 = vrot.lane.b32.xlu1 %v862_v2, %s2142_s19 }
 0xbaa   :  { %v864_v3 = vpop.f32.mrf.mxu2 }
 0xbb2   :  { %v992_v4 = vpop.f32.mrf.mxu2 }
 0xbb3   :  { %997 = vrot.lane.b32.xlu2 %v992_v4, %s2142_s19  ;;  %v1560_v4 = vld [vmem:[%s2125_s12 + $0x38] sm:$0xff] }
 0xbb4   :  { %v800_v5 = vpop.f32.mrf.mxu1  ;;  %1207 = vmatpush.bf16.msrb.mxu3 %v1560_v4 }
 0xbb5   :  { %804 = vst.msk [vmem:[#allocation3] sm:$0xff] %vm176_vm9, %v800_v5  ;;  %v1559_v5 = vld [vmem:[%s2125_s12 + $0x30] sm:$0xff] }
 0xbb8   :  { %1208 = vmatpush.bf16.msrb.mxu3 %v1559_v5 }
 0xbba   :  { %v994_v6 = vpop.f32.mrf.mxu2 }
 0xbbb   :  { %v1558_v6 = vld [vmem:[%s2125_s12 + $0x28] sm:$0xff] }
 0xbbc   :  { %v802_v7 = vpop.f32.mrf.mxu1  ;;  %1209 = vmatpush.bf16.msrb.mxu3 %v1558_v6 }
 0xbbd   :  { %v1557_v7 = vld [vmem:[%s2125_s12 + $0x20] sm:$0xff] }
 0xbc0   :  { %1210 = vmatpush.bf16.msrb.mxu3 %v1557_v7 }
 0xbc4   :  { %v930_v8 = vpop.f32.mrf.mxu1 }
 0xbc5   :  { %934 = vst.msk [vmem:[#allocation3 + $0x8] sm:$0xff] %vm176_vm9, %v930_v8  ;;  %v1583_v8 = vld [vmem:[%s2124_s11 + $0x1] ss:$0 sm:$0xff] }
 0xbcc   :  { %v932_v9 = vpop.f32.mrf.mxu1 }
 0xc0d   :  { %v998_v13 = vpop.permute.xlu2 %997 }
 0xc0e   :  { %1000 = vst.msk [vmem:[#allocation3 + $0x8] sm:$0xff] %vm300_vm12, %v998_v13 }
 0xc15   :  { %v868_v14 = vpop.permute.xlu1 %867  ;;  %v1002_v16 = vld [vmem:[#allocation3 + $0x8] sm:$0xff] }
 0xc16   :  { %870 = vst.msk [vmem:[#allocation3] sm:$0xff] %vm300_vm12, %v868_v14 }
 0xc1d   :  { %v1001_v15 = vld [vmem:[#allocation3] sm:$0xff] }
 0xc1e   :  { %v1003_v17 = vpack.c.bf16 %v1002_v16, %v1001_v15 }
 0xc20   :  { %1492 = vmatmul.msk.bf16.vlgmr.msrb.gmra.mxu0 %vm65_vm0, %v1003_v17 }
 0xc9d   :  { %v1038_v19 = vpop.f32.mrf.mxu0 }
 0xc9e   :  { %v1039_v20 = vadd.f32 %v1580_v18, %v1038_v19 }
 0xca0   :  { %v1043_v21 = vadd.f32 %v1039_v20, %v1948_v33 }
 0xca2   :  { %v1049_v22 = vsel %vm65_vm0, %v1043_v21, 0.0 }
 0xca3   :  { %1050 = vadd.xlane.f32.xlu0 %v1049_v22 }
 0xca5   :  { %v1040_v23 = vpop.f32.mrf.mxu0 }
 0xca6   :  { %v1041_v24 = vadd.f32 %v1580_v18, %v1040_v23 }
 0xca8   :  { %v1044_v25 = vadd.f32 %v1041_v24, %v1950_v34  ;;  %v1556_v34 = vld [vmem:[%s2123_s10 + $0x18] sm:$0xff] }
 0xca9   :  { %1135 = vmatpush.bf16.msrb.mxu1 %v1556_v34 }
 0xcaa   :  { %v1052_v26 = vsel %vm65_vm0, %v1044_v25, 0.0 }
 0xcab   :  { %1053 = vadd.xlane.f32.xlu2 %v1052_v26 }
 0xcad   :  { %1136 = vmatpush.bf16.msrb.mxu1 %v1555_v41 }
 0xd16   :  { %v1051_v27 = vpop.xlane.xlu0 %1050 }
 0xd17   :  { %v1055_v28 = vmul.f32 %v1051_v27, %v1786_v10 }
 0xd19   :  { %v1057_v29 = vsub.f32 %v1043_v21, %v1055_v28 }
 0xd1b   :  { %v1059_v30 = vmul.f32 %v1057_v29, %v1057_v29 }
 0xd1d   :  { %v1061_v31 = vsel %vm65_vm0, %v1059_v30, 0.0 }
 0xd1e   :  { %v1054_v32 = vpop.xlane.xlu2 %1053  ;;  %1062 = vadd.xlane.f32.xlu1 %v1061_v31 }
 0xd1f   :  { %v1056_v33 = vmul.f32 %v1054_v32, %v1786_v10 }
 0xd21   :  { %v1058_v35 = vsub.f32 %v1044_v25, %v1056_v33  ;;  %v1584_v33 = vld [vmem:[%s2126_s13 + $0x1] ss:$0 sm:$0xff] }
 0xd23   :  { %v1060_v36 = vmul.f32 %v1058_v35, %v1058_v35 }
 0xd25   :  { %v1064_v37 = vsel %vm65_vm0, %v1060_v36, 0.0 }
 0xd26   :  { %1065 = vadd.xlane.f32.xlu0 %v1064_v37 }
 0xd91   :  { %v1063_v38 = vpop.xlane.xlu1 %1062 }
 0xd92   :  { %v1067_v39 = vmul.f32 %v1063_v38, %v1786_v10 }
 0xd94   :  { %v1069_v40 = vadd.f32 1e-12, %v1067_v39 }
 0xd96   :  { %1637 = vrsqrt.f32 %v1069_v40  ;;  %vm1077_vm9 = vweird.f32 %v1069_v40 }
 0xd99   :  { %v1066_v42 = vpop.xlane.xlu0 %1065 }
 0xd9a   :  { %v1068_v43 = vmul.f32 %v1066_v42, %v1786_v10 }
 0xd9c   :  { %v1638_v44 = vpop.eup %1637  ;;  %v1070_v45 = vadd.f32 1e-12, %v1068_v43 }
 0xd9d   :  { %v1072_v46 = vmul.f32 %v1638_v44, %v1069_v40  ;;  %vm1078_vm8 = vweird.f32 %v1638_v44 }
 0xd9e   :  { %1639 = vrsqrt.f32 %v1070_v45  ;;  %vm1079_vm10 = vmor %vm1077_vm9, %vm1078_vm8  ;;  %vm1087_vm12 = vweird.f32 %v1070_v45 }
 0xd9f   :  { %v1073_v47 = vmul.f32 %v1638_v44, %v1072_v46 }
 0xda1   :  { %v1074_v48 = vmul.f32 0.5, %v1073_v47 }
 0xda3   :  { %v1075_v49 = vsub.f32 1.5, %v1074_v48 }
 0xda4   :  { %v1640_v51 = vpop.eup %1639 }
 0xda5   :  { %v1076_v52 = vmul.f32 %v1638_v44, %v1075_v49  ;;  %v1082_v53 = vmul.f32 %v1640_v51, %v1070_v45  ;;  %vm1088_vm11 = vweird.f32 %v1640_v51 }
 0xda6   :  { %vm1089_vm1 = vmor %vm1087_vm12, %vm1088_vm11 }
 0xda7   :  { %v1083_v50 = vmul.f32 %v1640_v51, %v1082_v53  ;;  %v1080_v54 = vsel %vm1079_vm10, %v1638_v44, %v1076_v52  ;;  %v1286_v53 = vld [vmem:[%s2129_s16 + $0x38] sm:$0xff] }
 0xda8   :  { %v1091_v58 = vmul.f32 %v1080_v54, %v1057_v29  ;;  %1305 = vmatpush.msra.mxu2 %v1286_v53  ;;  %1356 = vmatpush.msra.mxu1 %v1286_v53 }
 0xda9   :  { %v1084_v55 = vmul.f32 0.5, %v1083_v50  ;;  %v1282_v50 = vld [vmem:[%s2129_s16 + $0x18] sm:$0xff] }
 0xdaa   :  { %v1096_v62 = vmul.f32 %v1581_v57, %v1091_v58  ;;  %1328 = vmatpush.msra.mxu0 %v1282_v50  ;;  %1379 = vmatpush.msra.mxu3 %v1282_v50  ;;  %v1284_v58 = vld [vmem:[%s2129_s16 + $0x28] sm:$0xff] }
 0xdab   :  { %v1085_v56 = vsub.f32 1.5, %v1084_v55  ;;  %v1285_v55 = vld [vmem:[%s2129_s16 + $0x30] sm:$0xff] }
 0xdac   :  { %v1101_v1 = vadd.f32 %v1582_v61, %v1096_v62  ;;  %1306 = vmatpush.msra.mxu2 %v1285_v55  ;;  %1357 = vmatpush.msra.mxu1 %v1285_v55  ;;  %v1279_v62 = vld [vmem:[%s2129_s16] sm:$0xff] }
 0xdad   :  { %v1086_v59 = vmul.f32 %v1640_v51, %v1085_v56  ;;  %v1281_v56 = vld [vmem:[%s2129_s16 + $0x10] sm:$0xff] }
 0xdae   :  { %1329 = vmatpush.msra.mxu0 %v1281_v56  ;;  %1380 = vmatpush.msra.mxu3 %v1281_v56 }
 0xdaf   :  { %v1090_v60 = vsel %vm1089_vm1, %v1640_v51, %v1086_v59  ;;  %v1280_v59 = vld [vmem:[%s2129_s16 + $0x8] sm:$0xff]  ;;  %1307 = vmatpush.msra.mxu2 %v1284_v58  ;;  %1358 = vmatpush.msra.mxu1 %v1284_v58 }
 0xdb0   :  { %v1092_v63 = vmul.f32 %v1090_v60, %v1058_v35  ;;  %1330 = vmatpush.msra.mxu0 %v1280_v59  ;;  %1381 = vmatpush.msra.mxu3 %v1280_v59 }
 0xdb2   :  { %v1097_v0 = vmul.f32 %v1581_v57, %v1092_v63  ;;  %1331 = vmatpush.msra.mxu0 %v1279_v62  ;;  %1382 = vmatpush.msra.mxu3 %v1279_v62 }
 0xdb4   :  { %v1102_v2 = vadd.f32 %v1582_v61, %v1097_v0  ;;  %v1283_v61 = vld [vmem:[%s2129_s16 + $0x20] sm:$0xff] }
 0xdb5   :  { %1308 = vmatpush.msra.mxu2 %v1283_v61  ;;  %1359 = vmatpush.msra.mxu1 %v1283_v61 }
 0xdb6   :  { %v1103_v3 = vpack.c.bf16 %v1102_v2, %v1101_v1 }
 0xdb8   :  { %1508 = vmatmul.msk.bf16.vlgmr.msrb.gmra.mxu1 %vm65_vm0, %v1103_v3 }
 0xe35   :  { %v1138_v9 = vpop.f32.mrf.mxu1 }
 0xe36   :  { %v1139_v11 = vadd.f32 %v1583_v8, %v1138_v9 }
 0xe38   :  { %v1145_v12 = vmul.f32 0.044715, %v1139_v11  ;;  %v1143_v27 = vmul.f32 0.5, %v1139_v11 }
 0xe3a   :  { %v1147_v13 = vmul.f32 %v1145_v12, %v1139_v11 }
 0xe3c   :  { %v1149_v14 = vmul.f32 %v1147_v13, %v1139_v11 }
 0xe3d   :  { %v1140_v15 = vpop.f32.mrf.mxu1 }
 0xe3e   :  { %v1151_v16 = vadd.f32 %v1149_v14, %v1139_v11  ;;  %v1141_v17 = vadd.f32 %v1583_v8, %v1140_v15  ;;  %v1585_v11 = vld [vmem:[%s2127_s14 + $0x1] ss:$0 sm:$0xff] }
 0xe40   :  { %v1146_v18 = vmul.f32 0.044715, %v1141_v17  ;;  %v1153_v19 = vmul.f32 0.7978846, %v1151_v16  ;;  %v1144_v28 = vmul.f32 0.5, %v1141_v17 }
 0xe42   :  { %v1148_v20 = vmul.f32 %v1146_v18, %v1141_v17  ;;  %1641 = vtanh.f32 %v1153_v19 }
 0xe44   :  { %v1150_v21 = vmul.f32 %v1148_v20, %v1141_v17 }
 0xe46   :  { %v1152_v22 = vadd.f32 %v1150_v21, %v1141_v17 }
 0xe48   :  { %v1154_v23 = vmul.f32 0.7978846, %v1152_v22  ;;  %v1642_v24 = vpop.eup %1641 }
 0xe49   :  { %v1157_v25 = vadd.f32 1.0, %v1642_v24 }
 0xe4a   :  { %1643 = vtanh.f32 %v1154_v23 }
 0xe4b   :  { %v1159_v30 = vmul.f32 %v1157_v25, %v1143_v27 }
 0xe50   :  { %v1644_v26 = vpop.eup %1643 }
 0xe51   :  { %v1158_v29 = vadd.f32 1.0, %v1644_v26 }
 0xe53   :  { %v1160_v31 = vmul.f32 %v1158_v29, %v1144_v28  ;;  %v1287_v29 = vld [vmem:[%s2130_s17] sm:$0x1] }
 0xe55   :  { %v1161_v32 = vpack.c.bf16 %v1160_v31, %v1159_v30 }
 0xe57   :  { %1534 = vmatmul.msk.bf16.vlgmr.msrb.gmra.mxu3 %vm623_vm4, %v1161_v32 }
 0xeda   :  { %v1212_v35 = vpop.f32.mrf.mxu3 }
 0xedb   :  { %v1213_v36 = vadd.f32 %v1584_v33, %v1212_v35 }
 0xedd   :  { %v1217_v37 = vadd.f32 %v1213_v36, %v1101_v1 }
 0xedf   :  { %v1223_v34 = vsel %vm65_vm0, %v1217_v37, 0.0 }
 0xee0   :  { %1224 = vadd.xlane.f32.xlu2 %v1223_v34 }
 0xee2   :  { %v1214_v38 = vpop.f32.mrf.mxu3 }
 0xee3   :  { %v1215_v39 = vadd.f32 %v1584_v33, %v1214_v38 }
 0xee5   :  { %v1218_v40 = vadd.f32 %v1215_v39, %v1102_v2 }
 0xee7   :  { %v1226_v41 = vsel %vm65_vm0, %v1218_v40, 0.0 }
 0xee8   :  { %1227 = vadd.xlane.f32.xlu0 %v1226_v41 }
 0xf53   :  { %v1225_v42 = vpop.xlane.xlu2 %1224 }
 0xf54   :  { %v1229_v43 = vmul.f32 %v1225_v42, %v1786_v10 }
 0xf56   :  { %v1231_v44 = vsub.f32 %v1217_v37, %v1229_v43 }
 0xf58   :  { %v1233_v45 = vmul.f32 %v1231_v44, %v1231_v44 }
 0xf5a   :  { %v1235_v46 = vsel %vm65_vm0, %v1233_v45, 0.0 }
 0xf5b   :  { %v1228_v47 = vpop.xlane.xlu0 %1227  ;;  %1236 = vadd.xlane.f32.xlu2 %v1235_v46 }
 0xf5c   :  { %v1230_v48 = vmul.f32 %v1228_v47, %v1786_v10 }
 0xf5e   :  { %v2063_v49 = vsub.f32 %v1218_v40, %v1230_v48 }
 0xf60   :  { %v1234_v51 = vmul.f32 %v2063_v49, %v2063_v49 }
 0xf62   :  { %v1238_v52 = vsel %vm65_vm0, %v1234_v51, 0.0 }
 0xf63   :  { %1239 = vadd.xlane.f32.xlu0 %v1238_v52 }
 0xfce   :  { %v1237_v54 = vpop.xlane.xlu2 %1236 }
 0xfcf   :  { %v1241_v57 = vmul.f32 %v1237_v54, %v1786_v10 }
 0xfd1   :  { %v1243_v60 = vadd.f32 1e-12, %v1241_v57 }
 0xfd3   :  { %1645 = vrsqrt.f32 %v1243_v60  ;;  %vm1251_vm3 = vweird.f32 %v1243_v60 }
 0xfd6   :  { %v1240_v63 = vpop.xlane.xlu0 %1239 }
 0xfd7   :  { %v1242_v0 = vmul.f32 %v1240_v63, %v1786_v10  ;;  %v1586_v10 = vld [vmem:[%s2128_s15 + $0x1] ss:$0 sm:$0xff] }
 0xfd9   :  { %v1646_v1 = vpop.eup %1645  ;;  %v1244_v2 = vadd.f32 1e-12, %v1242_v0 }
 0xfda   :  { %v1246_v3 = vmul.f32 %v1646_v1, %v1243_v60  ;;  %vm1252_vm2 = vweird.f32 %v1646_v1 }
 0xfdb   :  { %1647 = vrsqrt.f32 %v1244_v2  ;;  %vm1253_vm4 = vmor %vm1251_vm3, %vm1252_vm2  ;;  %vm1261_vm6 = vweird.f32 %v1244_v2 }
 0xfdc   :  { %v1247_v4 = vmul.f32 %v1646_v1, %v1246_v3 }
 0xfde   :  { %v1248_v5 = vmul.f32 0.5, %v1247_v4 }
 0xfe0   :  { %v1249_v6 = vsub.f32 1.5, %v1248_v5 }
 0xfe1   :  { %v1648_v7 = vpop.eup %1647 }
 0xfe2   :  { %v1250_v8 = vmul.f32 %v1646_v1, %v1249_v6  ;;  %v1256_v9 = vmul.f32 %v1648_v7, %v1244_v2  ;;  %vm1262_vm5 = vweird.f32 %v1648_v7 }
 0xfe3   :  { %vm1263_vm7 = vmor %vm1261_vm6, %vm1262_vm5 }
 0xfe4   :  { %v1254_v12 = vsel %vm1253_vm4, %v1646_v1, %v1250_v8  ;;  %v1257_v13 = vmul.f32 %v1648_v7, %v1256_v9 }
 0xfe5   :  { %v1265_v14 = vmul.f32 %v1254_v12, %v1231_v44 }
 0xfe6   :  { %v1258_v15 = vmul.f32 0.5, %v1257_v13 }
 0xfe7   :  { %v1270_v16 = vmul.f32 %v1585_v11, %v1265_v14 }
 0xfe8   :  { %v1259_v17 = vsub.f32 1.5, %v1258_v15 }
 0xfe9   :  { %v1275_v18 = vadd.f32 %v1586_v10, %v1270_v16 }
 0xfea   :  { %v1260_v19 = vmul.f32 %v1648_v7, %v1259_v17 }
 0xfeb   :  { %1277 = vst.msk [vmem:[#allocation3] sm:$0xff] %vm65_vm0, %v1275_v18 }
 0xfec   :  { %v1264_v20 = vsel %vm1263_vm7, %v1648_v7, %v1260_v19 }
 0xfed   :  { %v1266_v21 = vmul.f32 %v1264_v20, %v2063_v49 }
 0xfef   :  { %v1271_v22 = vmul.f32 %v1585_v11, %v1266_v21 }
 0xff1   :  { %v1276_v23 = vadd.f32 %v1586_v10, %v1271_v22 }
 0xff2   :  { %v1289_v24 = vld [vmem:[#allocation3 + $0x7] sm:$0x1]  ;;  %v1288_v25 = vld [vmem:[#allocation3] sm:$0x1] }
 0xff3   :  { %1278 = vst.msk [vmem:[#allocation3 + $0x8] sm:$0xff] %vm65_vm0, %v1276_v23  ;;  %1537 = vmatmul.msk.f32.vlgmr.msra.gmra.mxu2 %vm65_vm0, %v1289_v24  ;;  %1538 = vmatmul.msk.f32.vlgmr.msra.gmra.mxu0 %vm65_vm0, %v1288_v25 }
 0xffa   :  { %v1340_v26 = vld [vmem:[#allocation3 + $0xf] sm:$0x1]  ;;  %v1339_v27 = vld [vmem:[#allocation3 + $0x8] sm:$0x1] }
 0xffb   :  { %1539 = vmatmul.msk.f32.vlgmr.msra.gmra.mxu1 %vm65_vm0, %v1340_v26  ;;  %1540 = vmatmul.msk.f32.vlgmr.msra.gmra.mxu3 %vm65_vm0, %v1339_v27 }
0x1070   :  { %v1333_v28 = vpop.f32.mrf.mxu0 }
0x1076   :  { %v1310_v30 = vpop.f32.mrf.mxu2 }
0x1077   :  { %v1334_v31 = vadd.f32 %v1333_v28, %v1310_v30 }
0x1078   :  { %v1361_v33 = vpop.f32.mrf.mxu1 }
0x1079   :  { %v1336_v32 = vadd.f32 %v1334_v31, %v1287_v29 }
0x107b   :  { %1338 = vst.msk [vmem:[#allocation4] sm:$0x1] %vm1337_vm13, %v1336_v32 }
0x107e   :  { %v1384_v35 = vpop.f32.mrf.mxu3 }
0x107f   :  { %v1385_v36 = vadd.f32 %v1384_v35, %v1361_v33 }
0x1081   :  { %v1387_v37 = vadd.f32 %v1385_v36, %v1287_v29 }
0x1083   :  { %1388 = vst.msk [vmem:[#allocation4 + $0x1] sm:$0x1] %vm1337_vm13, %v1387_v37 }
0x1084   :  { %1399 = dma.vmem_to_hbm [thread:$0]  %s1395_s28, 32, %s1397_s21, [#allocation5]  }
0x1085   :  { %1673 = dma.done.wait [#allocation5], 32  }
0x1086   :  { %1674 = vsyncadd [#allocation5], 4294967264 }
0x1087   :  { %1404 = vsyncpa [#allocation5], 1 }

</bundles_post_ra>
